<compile_context>
chip_gen: v7x
topology: tpu7x:2x2x1
jax: 0.10.0
libtpu: 0.0.40
codegen_flags: <defaults>
</compile_context>

<pallas_src>
import functools

import jax
import jax.numpy as jnp
from jax import lax
from jax.experimental import pallas as pl
from jax.experimental.pallas import tpu as pltpu

BN_EPS = 1e-5


def _round_up(x, m):
    return (x + m - 1) // m * m


def _chunk(n, max_chunk):
    """Largest divisor of n that is <= max_chunk (>= 1)."""
    best = 1
    for c in range(1, max(1, min(n, max_chunk)) + 1):
        if n % c == 0:
            best = c
    return best


def _conv_stats_kernel(x_ref, mask_ref, wc_ref, y_ref, ssum_ref, ssq_ref,
                       xpad_ref, patch_ref, *, H, W, Cin, Cin8, PAD):
    """Fused depthwise(3x3)+pointwise(1x1) conv + BN partial sums.

    x_ref     : (B, Cin, H*W)      chunk of samples (channels on sublanes)
    mask_ref  : (9, H*W)           per-tap border-validity mask
    wc_ref    : (Cq, 9*Cin8)       combined dw*pw weight, K zero-padded to Cin8
    y_ref     : (B, Cq, H*W)       pre-BN conv output (lane-dense)
    ssum_ref  : (Cq, 1)            per-channel running sum   (accumulated over grid)
    ssq_ref   : (Cq, 1)            per-channel running sum^2 (accumulated over grid)
    xpad_ref  : (Cin, H*W + 2*PAD) flat line buffer with zero halos  (scratch)
    patch_ref : (9*Cin8, H*W)      im2col patch scratch
    """
    B = x_ref.shape[0]
    HW = H * W

    @pl.when(pl.program_id(0) == 0)
    def _init():
        # One-time zeroing: the halos of the line buffer and the K-padding rows
        # of the patch scratch stay zero for the whole grid (interiors are
        # fully overwritten every sample), and the BN accumulators start at 0.
        xpad_ref[...] = jnp.zeros_like(xpad_ref)
        patch_ref[...] = jnp.zeros_like(patch_ref)
        ssum_ref[...] = jnp.zeros_like(ssum_ref)
        ssq_ref[...] = jnp.zeros_like(ssq_ref)

    for s in range(B):
        x_s = x_ref[s]                                    # (Cin, HW)
        xpad_ref[:, PAD:PAD + HW] = x_s                   # lane-aligned interior store
        # im2col: the 9 taps are static lane-offset windows of the padded line
        # buffer; masks zero the positions where a flattened shift would wrap
        # across an image row (h-borders already read the zero halos).
        for k in range(9):
            dh, dw = k // 3 - 1, k % 3 - 1
            off = dh * W + dw
            if off == 0:
                tap = x_s
            else:
                tap = xpad_ref[:, PAD + off:PAD + off + HW] * mask_ref[k:k + 1, :]
            patch_ref[k * Cin8:k * Cin8 + Cin, :] = tap
        # Whole conv = one MXU contraction: (Cq, 9*Cin8) @ (9*Cin8, HW).
        y_s = jnp.dot(wc_ref[...], patch_ref[...],
                      preferred_element_type=jnp.float32)  # (Cq, HW)
        y_ref[s] = y_s
        ssum_ref[...] += jnp.sum(y_s, axis=1, keepdims=True)
        ssq_ref[...] += jnp.sum(y_s * y_s, axis=1, keepdims=True)


def _bn_relu_kernel(y_ref, ssum_ref, ssq_ref, gamma_ref, beta_ref, o_ref, *, count):
    """Fold batch statistics into per-channel scale/shift and apply BN + ReLU."""
    inv_n = 1.0 / count
    mean = ssum_ref[...] * inv_n                                   # (Cq, 1)
    var = jnp.maximum(ssq_ref[...] * inv_n - mean * mean, 0.0)     # biased (training BN)
    scale = gamma_ref[...] * lax.rsqrt(var + BN_EPS)               # (Cq, 1)
    shift = beta_ref[...] - mean * scale
    o_ref[...] = jnp.maximum(y_ref[...] * scale + shift, 0.0)


def depthwise_separable_conv(x_nchw, dw_weight, pw_weight, gamma, beta):
    """Forward of DepthwiseSeparableConv: dw 3x3 -> pw 1x1 -> BatchNorm2d -> ReLU."""
    # TODO(synk): only the module's default hyper-parameters are implemented
    # (kernel_size=3, stride=1, padding=1).
    N, Cin, H, W = x_nchw.shape
    Cout = pw_weight.shape[0]
    HW = H * W
    Cin8 = _round_up(Cin, 8)            # sublane-aligned tap stride in the patch
    Cq = _round_up(Cout, 8)             # sublane-aligned output channels
    K9 = 9 * Cin8
    PAD = _round_up(W + 1, 128)         # lane-aligned halo of the flat line buffer
    f32 = jnp.float32

    # NCHW-native: only free reshapes (no transposes).  Channels -> sublanes,
    # flattened H*W -> lanes.
    x = x_nchw.reshape(N, Cin, HW).astype(f32)

    # Combined depthwise*pointwise weight: wc[co, k*Cin8 + ci] = pw[co,ci]*dw[ci,k].
    dww = dw_weight[:, 0, :, :].reshape(Cin, 9).astype(f32)        # (Cin, 9)
    pww = pw_weight[:, :, 0, 0].astype(f32)                        # (Cout, Cin)
    wc = pww[:, None, :] * jnp.transpose(dww)[None, :, :]          # (Cout, 9, Cin)
    wc = jnp.pad(wc, ((0, Cq - Cout), (0, 0), (0, Cin8 - Cin)))
    wc = wc.reshape(Cq, K9)

    # Per-tap border validity mask (9, HW).
    pos = jnp.arange(HW, dtype=jnp.int32)
    hh, ww = pos // W, pos % W
    masks = []
    for k in range(9):
        dh, dw = k // 3 - 1, k % 3 - 1
        ok = (hh + dh >= 0) & (hh + dh < H) & (ww + dw >= 0) & (ww + dw < W)
        masks.append(ok)
    mask = jnp.stack(masks, axis=0).astype(f32)

    # ---- pass 1: conv (MXU) + accumulated BN partial sums --------------------
    budget = 8 * 1024 * 1024
    b1 = _chunk(N, min(8, max(1, budget // max(1, (Cin + Cq) * HW * 4 * 2))))
    conv_kernel = functools.partial(_conv_stats_kernel, H=H, W=W,
                                    Cin=Cin, Cin8=Cin8, PAD=PAD)
    y, ssum, ssq = pl.pallas_call(
        conv_kernel,
        out_shape=(jax.ShapeDtypeStruct((N, Cq, HW), f32),
                   jax.ShapeDtypeStruct((Cq, 1), f32),
                   jax.ShapeDtypeStruct((Cq, 1), f32)),
        grid_spec=pltpu.PrefetchScalarGridSpec(
            num_scalar_prefetch=0,
            grid=(N // b1,),
            in_specs=[
                pl.BlockSpec((b1, Cin, HW), lambda n: (n, 0, 0)),
                pl.BlockSpec((9, HW), lambda n: (0, 0)),
                pl.BlockSpec((Cq, K9), lambda n: (0, 0)),
            ],
            out_specs=(
                pl.BlockSpec((b1, Cq, HW), lambda n: (n, 0, 0)),
                pl.BlockSpec((Cq, 1), lambda n: (0, 0)),
                pl.BlockSpec((Cq, 1), lambda n: (0, 0)),
            ),
            scratch_shapes=[
                pltpu.VMEM((Cin, HW + 2 * PAD), f32),
                pltpu.VMEM((K9, HW), f32),
            ],
        ),
        compiler_params=pltpu.CompilerParams(
            # BN stats accumulate in revisited blocks -> batch axis stays sequential.
            dimension_semantics=("arbitrary",)),
    )(x, mask, wc)

    # ---- pass 2: fold stats -> scale/shift in-kernel, apply BN + ReLU --------
    gamma_p = jnp.pad(gamma.astype(f32), (0, Cq - Cout)).reshape(Cq, 1)
    beta_p = jnp.pad(beta.astype(f32), (0, Cq - Cout)).reshape(Cq, 1)
    b2 = _chunk(N, min(512, max(1, budget // max(1, 2 * Cq * HW * 4 * 2))))
    bn_kernel = functools.partial(_bn_relu_kernel, count=float(N * HW))
    out = pl.pallas_call(
        bn_kernel,
        out_shape=jax.ShapeDtypeStruct((N, Cq, HW), f32),
        grid_spec=pltpu.PrefetchScalarGridSpec(
            num_scalar_prefetch=0,
            grid=(N // b2,),
            in_specs=[
                pl.BlockSpec((b2, Cq, HW), lambda n: (n, 0, 0)),
                pl.BlockSpec((Cq, 1), lambda n: (0, 0)),
                pl.BlockSpec((Cq, 1), lambda n: (0, 0)),
                pl.BlockSpec((Cq, 1), lambda n: (0, 0)),
                pl.BlockSpec((Cq, 1), lambda n: (0, 0)),
            ],
            out_specs=pl.BlockSpec((b2, Cq, HW), lambda n: (n, 0, 0)),
        ),
        compiler_params=pltpu.CompilerParams(
            dimension_semantics=("parallel",)),
    )(y, ssum, ssq, gamma_p, beta_p)

    # Free reshape back to the PyTorch NCHW contract (drop sublane channel
    # padding if Cout was not a multiple of 8).
    return out[:, :Cout, :].reshape(N, Cout, H, W)


def _reference(x_nchw, dw_weight, pw_weight, gamma, beta):
    """Pure-JAX reference (lax convs at HIGHEST precision) of the forward."""
    Cin = x_nchw.shape[1]
    dn = ("NCHW", "OIHW", "NCHW")
    hp = lax.Precision.HIGHEST
    dw = lax.conv_general_dilated(x_nchw, dw_weight, (1, 1), ((1, 1), (1, 1)),
                                  feature_group_count=Cin, dimension_numbers=dn,
                                  precision=hp)
    y = lax.conv_general_dilated(dw, pw_weight, (1, 1), ((0, 0), (0, 0)),
                                 dimension_numbers=dn, precision=hp)
    mean = jnp.mean(y, axis=(0, 2, 3), keepdims=True)
    var = jnp.mean((y - mean) ** 2, axis=(0, 2, 3), keepdims=True)
    out = (y - mean) * lax.rsqrt(var + BN_EPS)
    out = out * gamma.reshape(1, -1, 1, 1) + beta.reshape(1, -1, 1, 1)
    return jnp.maximum(out, 0.0)


if __name__ == "__main__":
    N, Cin, Cout, H, W = 2, 4, 8, 16, 16

    key = jax.random.PRNGKey(0)
    kx, kdw, kpw, kg, kb = jax.random.split(key, 5)

    x = jax.random.normal(kx, (N, Cin, H, W), dtype=jnp.float32)
    dw_weight = jax.random.normal(kdw, (Cin, 1, 3, 3), dtype=jnp.float32) * 0.3
    pw_weight = jax.random.normal(kpw, (Cout, Cin, 1, 1), dtype=jnp.float32) * 0.3
    gamma = 1.0 + 0.1 * jax.random.normal(kg, (Cout,), dtype=jnp.float32)
    beta = 0.1 * jax.random.normal(kb, (Cout,), dtype=jnp.float32)

    fn = jax.jit(depthwise_separable_conv)
    out = jax.block_until_ready(fn(x, dw_weight, pw_weight, gamma, beta))

    ref = _reference(x, dw_weight, pw_weight, gamma, beta)
    assert out.shape == (N, Cout, H, W)
    max_err = float(jnp.max(jnp.abs(out - ref)))
    assert jnp.allclose(out, ref, rtol=5e-3, atol=5e-3), max_err

    print("KERNEL_OK")
</pallas_src>

<mosaic_0001>
module attributes {stable_mosaic.version = 11 : i64} {
  func.func @_conv_stats_kernel(%arg0: i32, %arg1: memref<2x4x256xf32, #tpu.memory_space<vmem>>, %arg2: memref<9x256xf32, #tpu.memory_space<vmem>>, %arg3: memref<8x72xf32, #tpu.memory_space<vmem>>, %arg4: memref<2x8x256xf32, #tpu.memory_space<vmem>>, %arg5: memref<8x1xf32, #tpu.memory_space<vmem>>, %arg6: memref<8x1xf32, #tpu.memory_space<vmem>>, %arg7: memref<4x512xf32, #tpu.memory_space<vmem>>, %arg8: memref<72x256xf32, #tpu.memory_space<vmem>>) attributes {dimension_semantics = [#tpu.dimension_semantics<arbitrary>], iteration_bounds = array<i64: 1>, scalar_prefetch = 0 : i64, scratch_operands = 2 : i64, tpu.core_type = #tpu.core_type<tc>, window_params = [{transform_indices = @transform_0, window_bounds = array<i64: 2, 4, 256>}, {pipeline_mode = #tpu.pipeline_mode<synchronous>, transform_indices = @transform_1, window_bounds = array<i64: 9, 256>}, {pipeline_mode = #tpu.pipeline_mode<synchronous>, transform_indices = @transform_2, window_bounds = array<i64: 8, 72>}, {transform_indices = @transform_3, window_bounds = array<i64: 2, 8, 256>}, {pipeline_mode = #tpu.pipeline_mode<synchronous>, transform_indices = @transform_4, window_bounds = array<i64: 8, 1>}, {pipeline_mode = #tpu.pipeline_mode<synchronous>, transform_indices = @transform_5, window_bounds = array<i64: 8, 1>}]} {
    %c0_i32 = arith.constant 0 : i32
    %0 = arith.cmpi eq, %arg0, %c0_i32 : i32
    %1 = arith.extui %0 : i1 to i32
    %c0_i32_0 = arith.constant 0 : i32
    %2 = arith.cmpi ne, %1, %c0_i32_0 : i32
    scf.if %2 {
      %cst_122 = arith.constant 0.000000e+00 : f32
      %125 = vector.broadcast %cst_122 : f32 to vector<4x512xf32>
      %c0_123 = arith.constant 0 : index
      %c0_124 = arith.constant 0 : index
      %126 = vector.load %arg7[%c0_123, %c0_124] : memref<4x512xf32, #tpu.memory_space<vmem>>, vector<4x512xf32>
      tpu.vector_store %arg7[%c0_123, %c0_124], %125 {strides = array<i32>} : memref<4x512xf32, #tpu.memory_space<vmem>>, vector<4x512xf32>,
      %cst_125 = arith.constant 0.000000e+00 : f32
      %127 = vector.broadcast %cst_125 : f32 to vector<72x256xf32>
      %c0_126 = arith.constant 0 : index
      %c0_127 = arith.constant 0 : index
      %128 = vector.load %arg8[%c0_126, %c0_127] : memref<72x256xf32, #tpu.memory_space<vmem>>, vector<72x256xf32>
      tpu.vector_store %arg8[%c0_126, %c0_127], %127 {strides = array<i32>} : memref<72x256xf32, #tpu.memory_space<vmem>>, vector<72x256xf32>,
      %cst_128 = arith.constant 0.000000e+00 : f32
      %129 = vector.broadcast %cst_128 : f32 to vector<8x1xf32>
      %c0_129 = arith.constant 0 : index
      %c0_130 = arith.constant 0 : index
      %130 = vector.load %arg5[%c0_129, %c0_130] : memref<8x1xf32, #tpu.memory_space<vmem>>, vector<8x1xf32>
      tpu.vector_store %arg5[%c0_129, %c0_130], %129 {strides = array<i32>} : memref<8x1xf32, #tpu.memory_space<vmem>>, vector<8x1xf32>,
      %cst_131 = arith.constant 0.000000e+00 : f32
      %131 = vector.broadcast %cst_131 : f32 to vector<8x1xf32>
      %c0_132 = arith.constant 0 : index
      %c0_133 = arith.constant 0 : index
      %132 = vector.load %arg6[%c0_132, %c0_133] : memref<8x1xf32, #tpu.memory_space<vmem>>, vector<8x1xf32>
      tpu.vector_store %arg6[%c0_132, %c0_133], %131 {strides = array<i32>} : memref<8x1xf32, #tpu.memory_space<vmem>>, vector<8x1xf32>,
    } else {
    }
    %c0 = arith.constant 0 : index
    %c0_1 = arith.constant 0 : index
    %c0_2 = arith.constant 0 : index
    %3 = vector.load %arg1[%c0, %c0_1, %c0_2] : memref<2x4x256xf32, #tpu.memory_space<vmem>>, vector<1x4x256xf32>
    %4 = vector.shape_cast %3 : vector<1x4x256xf32> to vector<4x256xf32>
    %c0_3 = arith.constant 0 : index
    %c128 = arith.constant 128 : index
    %5 = vector.load %arg7[%c0_3, %c128] : memref<4x512xf32, #tpu.memory_space<vmem>>, vector<4x256xf32>
    tpu.vector_store %arg7[%c0_3, %c128], %4 {strides = array<i32>} : memref<4x512xf32, #tpu.memory_space<vmem>>, vector<4x256xf32>,
    %c0_4 = arith.constant 0 : index
    %c111 = arith.constant 111 : index
    %6 = vector.load %arg7[%c0_4, %c111] : memref<4x512xf32, #tpu.memory_space<vmem>>, vector<4x256xf32>
    %c0_5 = arith.constant 0 : index
    %c0_6 = arith.constant 0 : index
    %7 = vector.load %arg2[%c0_5, %c0_6] : memref<9x256xf32, #tpu.memory_space<vmem>>, vector<1x256xf32>
    %8 = vector.broadcast %7 : vector<1x256xf32> to vector<4x256xf32>
    %9 = arith.mulf %6, %8 : vector<4x256xf32>
    %c0_7 = arith.constant 0 : index
    %c0_8 = arith.constant 0 : index
    %10 = vector.load %arg8[%c0_7, %c0_8] : memref<72x256xf32, #tpu.memory_space<vmem>>, vector<4x256xf32>
    tpu.vector_store %arg8[%c0_7, %c0_8], %9 {strides = array<i32>} : memref<72x256xf32, #tpu.memory_space<vmem>>, vector<4x256xf32>,
    %c0_9 = arith.constant 0 : index
    %c112 = arith.constant 112 : index
    %11 = vector.load %arg7[%c0_9, %c112] : memref<4x512xf32, #tpu.memory_space<vmem>>, vector<4x256xf32>
    %c1 = arith.constant 1 : index
    %c0_10 = arith.constant 0 : index
    %12 = vector.load %arg2[%c1, %c0_10] : memref<9x256xf32, #tpu.memory_space<vmem>>, vector<1x256xf32>
    %13 = vector.broadcast %12 : vector<1x256xf32> to vector<4x256xf32>
    %14 = arith.mulf %11, %13 : vector<4x256xf32>
    %c8 = arith.constant 8 : index
    %c0_11 = arith.constant 0 : index
    %15 = vector.load %arg8[%c8, %c0_11] : memref<72x256xf32, #tpu.memory_space<vmem>>, vector<4x256xf32>
    tpu.vector_store %arg8[%c8, %c0_11], %14 {strides = array<i32>} : memref<72x256xf32, #tpu.memory_space<vmem>>, vector<4x256xf32>,
    %c0_12 = arith.constant 0 : index
    %c113 = arith.constant 113 : index
    %16 = vector.load %arg7[%c0_12, %c113] : memref<4x512xf32, #tpu.memory_space<vmem>>, vector<4x256xf32>
    %c2 = arith.constant 2 : index
    %c0_13 = arith.constant 0 : index
    %17 = vector.load %arg2[%c2, %c0_13] : memref<9x256xf32, #tpu.memory_space<vmem>>, vector<1x256xf32>
    %18 = vector.broadcast %17 : vector<1x256xf32> to vector<4x256xf32>
    %19 = arith.mulf %16, %18 : vector<4x256xf32>
    %c16 = arith.constant 16 : index
    %c0_14 = arith.constant 0 : index
    %20 = vector.load %arg8[%c16, %c0_14] : memref<72x256xf32, #tpu.memory_space<vmem>>, vector<4x256xf32>
    tpu.vector_store %arg8[%c16, %c0_14], %19 {strides = array<i32>} : memref<72x256xf32, #tpu.memory_space<vmem>>, vector<4x256xf32>,
    %c0_15 = arith.constant 0 : index
    %c127 = arith.constant 127 : index
    %21 = vector.load %arg7[%c0_15, %c127] : memref<4x512xf32, #tpu.memory_space<vmem>>, vector<4x256xf32>
    %c3 = arith.constant 3 : index
    %c0_16 = arith.constant 0 : index
    %22 = vector.load %arg2[%c3, %c0_16] : memref<9x256xf32, #tpu.memory_space<vmem>>, vector<1x256xf32>
    %23 = vector.broadcast %22 : vector<1x256xf32> to vector<4x256xf32>
    %24 = arith.mulf %21, %23 : vector<4x256xf32>
    %c24 = arith.constant 24 : index
    %c0_17 = arith.constant 0 : index
    %25 = vector.load %arg8[%c24, %c0_17] : memref<72x256xf32, #tpu.memory_space<vmem>>, vector<4x256xf32>
    tpu.vector_store %arg8[%c24, %c0_17], %24 {strides = array<i32>} : memref<72x256xf32, #tpu.memory_space<vmem>>, vector<4x256xf32>,
    %c32 = arith.constant 32 : index
    %c0_18 = arith.constant 0 : index
    %26 = vector.load %arg8[%c32, %c0_18] : memref<72x256xf32, #tpu.memory_space<vmem>>, vector<4x256xf32>
    tpu.vector_store %arg8[%c32, %c0_18], %4 {strides = array<i32>} : memref<72x256xf32, #tpu.memory_space<vmem>>, vector<4x256xf32>,
    %c0_19 = arith.constant 0 : index
    %c129 = arith.constant 129 : index
    %27 = vector.load %arg7[%c0_19, %c129] : memref<4x512xf32, #tpu.memory_space<vmem>>, vector<4x256xf32>
    %c5 = arith.constant 5 : index
    %c0_20 = arith.constant 0 : index
    %28 = vector.load %arg2[%c5, %c0_20] : memref<9x256xf32, #tpu.memory_space<vmem>>, vector<1x256xf32>
    %29 = vector.broadcast %28 : vector<1x256xf32> to vector<4x256xf32>
    %30 = arith.mulf %27, %29 : vector<4x256xf32>
    %c40 = arith.constant 40 : index
    %c0_21 = arith.constant 0 : index
    %31 = vector.load %arg8[%c40, %c0_21] : memref<72x256xf32, #tpu.memory_space<vmem>>, vector<4x256xf32>
    tpu.vector_store %arg8[%c40, %c0_21], %30 {strides = array<i32>} : memref<72x256xf32, #tpu.memory_space<vmem>>, vector<4x256xf32>,
    %c0_22 = arith.constant 0 : index
    %c143 = arith.constant 143 : index
    %32 = vector.load %arg7[%c0_22, %c143] : memref<4x512xf32, #tpu.memory_space<vmem>>, vector<4x256xf32>
    %c6 = arith.constant 6 : index
    %c0_23 = arith.constant 0 : index
    %33 = vector.load %arg2[%c6, %c0_23] : memref<9x256xf32, #tpu.memory_space<vmem>>, vector<1x256xf32>
    %34 = vector.broadcast %33 : vector<1x256xf32> to vector<4x256xf32>
    %35 = arith.mulf %32, %34 : vector<4x256xf32>
    %c48 = arith.constant 48 : index
    %c0_24 = arith.constant 0 : index
    %36 = vector.load %arg8[%c48, %c0_24] : memref<72x256xf32, #tpu.memory_space<vmem>>, vector<4x256xf32>
    tpu.vector_store %arg8[%c48, %c0_24], %35 {strides = array<i32>} : memref<72x256xf32, #tpu.memory_space<vmem>>, vector<4x256xf32>,
    %c0_25 = arith.constant 0 : index
    %c144 = arith.constant 144 : index
    %37 = vector.load %arg7[%c0_25, %c144] : memref<4x512xf32, #tpu.memory_space<vmem>>, vector<4x256xf32>
    %c7 = arith.constant 7 : index
    %c0_26 = arith.constant 0 : index
    %38 = vector.load %arg2[%c7, %c0_26] : memref<9x256xf32, #tpu.memory_space<vmem>>, vector<1x256xf32>
    %39 = vector.broadcast %38 : vector<1x256xf32> to vector<4x256xf32>
    %40 = arith.mulf %37, %39 : vector<4x256xf32>
    %c56 = arith.constant 56 : index
    %c0_27 = arith.constant 0 : index
    %41 = vector.load %arg8[%c56, %c0_27] : memref<72x256xf32, #tpu.memory_space<vmem>>, vector<4x256xf32>
    tpu.vector_store %arg8[%c56, %c0_27], %40 {strides = array<i32>} : memref<72x256xf32, #tpu.memory_space<vmem>>, vector<4x256xf32>,
    %c0_28 = arith.constant 0 : index
    %c145 = arith.constant 145 : index
    %42 = vector.load %arg7[%c0_28, %c145] : memref<4x512xf32, #tpu.memory_space<vmem>>, vector<4x256xf32>
    %c8_29 = arith.constant 8 : index
    %c0_30 = arith.constant 0 : index
    %43 = vector.load %arg2[%c8_29, %c0_30] : memref<9x256xf32, #tpu.memory_space<vmem>>, vector<1x256xf32>
    %44 = vector.broadcast %43 : vector<1x256xf32> to vector<4x256xf32>
    %45 = arith.mulf %42, %44 : vector<4x256xf32>
    %c64 = arith.constant 64 : index
    %c0_31 = arith.constant 0 : index
    %46 = vector.load %arg8[%c64, %c0_31] : memref<72x256xf32, #tpu.memory_space<vmem>>, vector<4x256xf32>
    tpu.vector_store %arg8[%c64, %c0_31], %45 {strides = array<i32>} : memref<72x256xf32, #tpu.memory_space<vmem>>, vector<4x256xf32>,
    %c0_32 = arith.constant 0 : index
    %c0_33 = arith.constant 0 : index
    %47 = vector.load %arg3[%c0_32, %c0_33] : memref<8x72xf32, #tpu.memory_space<vmem>>, vector<8x72xf32>
    %c0_34 = arith.constant 0 : index
    %c0_35 = arith.constant 0 : index
    %48 = vector.load %arg8[%c0_34, %c0_35] : memref<72x256xf32, #tpu.memory_space<vmem>>, vector<72x256xf32>
    %cst = arith.constant dense<0.000000e+00> : vector<8x256xf32>
    %49 = tpu.matmul %47, %48, %cst {dimension_numbers = #tpu.dot_dimension_numbers<[1], [0], [0], [1], [0, 0, 1, 1], [], []>} : vector<8x72xf32>, vector<72x256xf32>, vector<8x256xf32> -> vector<8x256xf32>
    %c0_36 = arith.constant 0 : index
    %c0_37 = arith.constant 0 : index
    %c0_38 = arith.constant 0 : index
    %50 = vector.load %arg4[%c0_36, %c0_37, %c0_38] : memref<2x8x256xf32, #tpu.memory_space<vmem>>, vector<1x8x256xf32>
    %51 = vector.shape_cast %50 : vector<1x8x256xf32> to vector<8x256xf32>
    %52 = vector.shape_cast %49 : vector<8x256xf32> to vector<1x8x256xf32>
    tpu.vector_store %arg4[%c0_36, %c0_37, %c0_38], %52 {strides = array<i32>} : memref<2x8x256xf32, #tpu.memory_space<vmem>>, vector<1x8x256xf32>,
    %c0_39 = arith.constant 0 : index
    %c0_40 = arith.constant 0 : index
    %53 = vector.load %arg5[%c0_39, %c0_40] : memref<8x1xf32, #tpu.memory_space<vmem>>, vector<8x1xf32>
    %cst_41 = arith.constant dense<0.000000e+00> : vector<8xf32>
    %54 = vector.multi_reduction <add>, %49, %cst_41 [1] : vector<8x256xf32> to vector<8xf32>
    %55 = vector.shape_cast %54 : vector<8xf32> to vector<8x1xf32>
    %56 = arith.addf %53, %55 : vector<8x1xf32>
    %c0_42 = arith.constant 0 : index
    %c0_43 = arith.constant 0 : index
    %57 = vector.load %arg5[%c0_42, %c0_43] : memref<8x1xf32, #tpu.memory_space<vmem>>, vector<8x1xf32>
    tpu.vector_store %arg5[%c0_42, %c0_43], %56 {strides = array<i32>} : memref<8x1xf32, #tpu.memory_space<vmem>>, vector<8x1xf32>,
    %c0_44 = arith.constant 0 : index
    %c0_45 = arith.constant 0 : index
    %58 = vector.load %arg6[%c0_44, %c0_45] : memref<8x1xf32, #tpu.memory_space<vmem>>, vector<8x1xf32>
    %59 = arith.mulf %49, %49 : vector<8x256xf32>
    %cst_46 = arith.constant dense<0.000000e+00> : vector<8xf32>
    %60 = vector.multi_reduction <add>, %59, %cst_46 [1] : vector<8x256xf32> to vector<8xf32>
    %61 = vector.shape_cast %60 : vector<8xf32> to vector<8x1xf32>
    %62 = arith.addf %58, %61 : vector<8x1xf32>
    %c0_47 = arith.constant 0 : index
    %c0_48 = arith.constant 0 : index
    %63 = vector.load %arg6[%c0_47, %c0_48] : memref<8x1xf32, #tpu.memory_space<vmem>>, vector<8x1xf32>
    tpu.vector_store %arg6[%c0_47, %c0_48], %62 {strides = array<i32>} : memref<8x1xf32, #tpu.memory_space<vmem>>, vector<8x1xf32>,
    %c1_49 = arith.constant 1 : index
    %c0_50 = arith.constant 0 : index
    %c0_51 = arith.constant 0 : index
    %64 = vector.load %arg1[%c1_49, %c0_50, %c0_51] : memref<2x4x256xf32, #tpu.memory_space<vmem>>, vector<1x4x256xf32>
    %65 = vector.shape_cast %64 : vector<1x4x256xf32> to vector<4x256xf32>
    %c0_52 = arith.constant 0 : index
    %c128_53 = arith.constant 128 : index
    %66 = vector.load %arg7[%c0_52, %c128_53] : memref<4x512xf32, #tpu.memory_space<vmem>>, vector<4x256xf32>
    tpu.vector_store %arg7[%c0_52, %c128_53], %65 {strides = array<i32>} : memref<4x512xf32, #tpu.memory_space<vmem>>, vector<4x256xf32>,
    %c0_54 = arith.constant 0 : index
    %c111_55 = arith.constant 111 : index
    %67 = vector.load %arg7[%c0_54, %c111_55] : memref<4x512xf32, #tpu.memory_space<vmem>>, vector<4x256xf32>
    %c0_56 = arith.constant 0 : index
    %c0_57 = arith.constant 0 : index
    %68 = vector.load %arg2[%c0_56, %c0_57] : memref<9x256xf32, #tpu.memory_space<vmem>>, vector<1x256xf32>
    %69 = vector.broadcast %68 : vector<1x256xf32> to vector<4x256xf32>
    %70 = arith.mulf %67, %69 : vector<4x256xf32>
    %c0_58 = arith.constant 0 : index
    %c0_59 = arith.constant 0 : index
    %71 = vector.load %arg8[%c0_58, %c0_59] : memref<72x256xf32, #tpu.memory_space<vmem>>, vector<4x256xf32>
    tpu.vector_store %arg8[%c0_58, %c0_59], %70 {strides = array<i32>} : memref<72x256xf32, #tpu.memory_space<vmem>>, vector<4x256xf32>,
    %c0_60 = arith.constant 0 : index
    %c112_61 = arith.constant 112 : index
    %72 = vector.load %arg7[%c0_60, %c112_61] : memref<4x512xf32, #tpu.memory_space<vmem>>, vector<4x256xf32>
    %c1_62 = arith.constant 1 : index
    %c0_63 = arith.constant 0 : index
    %73 = vector.load %arg2[%c1_62, %c0_63] : memref<9x256xf32, #tpu.memory_space<vmem>>, vector<1x256xf32>
    %74 = vector.broadcast %73 : vector<1x256xf32> to vector<4x256xf32>
    %75 = arith.mulf %72, %74 : vector<4x256xf32>
    %c8_64 = arith.constant 8 : index
    %c0_65 = arith.constant 0 : index
    %76 = vector.load %arg8[%c8_64, %c0_65] : memref<72x256xf32, #tpu.memory_space<vmem>>, vector<4x256xf32>
    tpu.vector_store %arg8[%c8_64, %c0_65], %75 {strides = array<i32>} : memref<72x256xf32, #tpu.memory_space<vmem>>, vector<4x256xf32>,
    %c0_66 = arith.constant 0 : index
    %c113_67 = arith.constant 113 : index
    %77 = vector.load %arg7[%c0_66, %c113_67] : memref<4x512xf32, #tpu.memory_space<vmem>>, vector<4x256xf32>
    %c2_68 = arith.constant 2 : index
    %c0_69 = arith.constant 0 : index
    %78 = vector.load %arg2[%c2_68, %c0_69] : memref<9x256xf32, #tpu.memory_space<vmem>>, vector<1x256xf32>
    %79 = vector.broadcast %78 : vector<1x256xf32> to vector<4x256xf32>
    %80 = arith.mulf %77, %79 : vector<4x256xf32>
    %c16_70 = arith.constant 16 : index
    %c0_71 = arith.constant 0 : index
    %81 = vector.load %arg8[%c16_70, %c0_71] : memref<72x256xf32, #tpu.memory_space<vmem>>, vector<4x256xf32>
    tpu.vector_store %arg8[%c16_70, %c0_71], %80 {strides = array<i32>} : memref<72x256xf32, #tpu.memory_space<vmem>>, vector<4x256xf32>,
    %c0_72 = arith.constant 0 : index
    %c127_73 = arith.constant 127 : index
    %82 = vector.load %arg7[%c0_72, %c127_73] : memref<4x512xf32, #tpu.memory_space<vmem>>, vector<4x256xf32>
    %c3_74 = arith.constant 3 : index
    %c0_75 = arith.constant 0 : index
    %83 = vector.load %arg2[%c3_74, %c0_75] : memref<9x256xf32, #tpu.memory_space<vmem>>, vector<1x256xf32>
    %84 = vector.broadcast %83 : vector<1x256xf32> to vector<4x256xf32>
    %85 = arith.mulf %82, %84 : vector<4x256xf32>
    %c24_76 = arith.constant 24 : index
    %c0_77 = arith.constant 0 : index
    %86 = vector.load %arg8[%c24_76, %c0_77] : memref<72x256xf32, #tpu.memory_space<vmem>>, vector<4x256xf32>
    tpu.vector_store %arg8[%c24_76, %c0_77], %85 {strides = array<i32>} : memref<72x256xf32, #tpu.memory_space<vmem>>, vector<4x256xf32>,
    %c32_78 = arith.constant 32 : index
    %c0_79 = arith.constant 0 : index
    %87 = vector.load %arg8[%c32_78, %c0_79] : memref<72x256xf32, #tpu.memory_space<vmem>>, vector<4x256xf32>
    tpu.vector_store %arg8[%c32_78, %c0_79], %65 {strides = array<i32>} : memref<72x256xf32, #tpu.memory_space<vmem>>, vector<4x256xf32>,
    %c0_80 = arith.constant 0 : index
    %c129_81 = arith.constant 129 : index
    %88 = vector.load %arg7[%c0_80, %c129_81] : memref<4x512xf32, #tpu.memory_space<vmem>>, vector<4x256xf32>
    %c5_82 = arith.constant 5 : index
    %c0_83 = arith.constant 0 : index
    %89 = vector.load %arg2[%c5_82, %c0_83] : memref<9x256xf32, #tpu.memory_space<vmem>>, vector<1x256xf32>
    %90 = vector.broadcast %89 : vector<1x256xf32> to vector<4x256xf32>
    %91 = arith.mulf %88, %90 : vector<4x256xf32>
    %c40_84 = arith.constant 40 : index
    %c0_85 = arith.constant 0 : index
    %92 = vector.load %arg8[%c40_84, %c0_85] : memref<72x256xf32, #tpu.memory_space<vmem>>, vector<4x256xf32>
    tpu.vector_store %arg8[%c40_84, %c0_85], %91 {strides = array<i32>} : memref<72x256xf32, #tpu.memory_space<vmem>>, vector<4x256xf32>,
    %c0_86 = arith.constant 0 : index
    %c143_87 = arith.constant 143 : index
    %93 = vector.load %arg7[%c0_86, %c143_87] : memref<4x512xf32, #tpu.memory_space<vmem>>, vector<4x256xf32>
    %c6_88 = arith.constant 6 : index
    %c0_89 = arith.constant 0 : index
    %94 = vector.load %arg2[%c6_88, %c0_89] : memref<9x256xf32, #tpu.memory_space<vmem>>, vector<1x256xf32>
    %95 = vector.broadcast %94 : vector<1x256xf32> to vector<4x256xf32>
    %96 = arith.mulf %93, %95 : vector<4x256xf32>
    %c48_90 = arith.constant 48 : index
    %c0_91 = arith.constant 0 : index
    %97 = vector.load %arg8[%c48_90, %c0_91] : memref<72x256xf32, #tpu.memory_space<vmem>>, vector<4x256xf32>
    tpu.vector_store %arg8[%c48_90, %c0_91], %96 {strides = array<i32>} : memref<72x256xf32, #tpu.memory_space<vmem>>, vector<4x256xf32>,
    %c0_92 = arith.constant 0 : index
    %c144_93 = arith.constant 144 : index
    %98 = vector.load %arg7[%c0_92, %c144_93] : memref<4x512xf32, #tpu.memory_space<vmem>>, vector<4x256xf32>
    %c7_94 = arith.constant 7 : index
    %c0_95 = arith.constant 0 : index
    %99 = vector.load %arg2[%c7_94, %c0_95] : memref<9x256xf32, #tpu.memory_space<vmem>>, vector<1x256xf32>
    %100 = vector.broadcast %99 : vector<1x256xf32> to vector<4x256xf32>
    %101 = arith.mulf %98, %100 : vector<4x256xf32>
    %c56_96 = arith.constant 56 : index
    %c0_97 = arith.constant 0 : index
    %102 = vector.load %arg8[%c56_96, %c0_97] : memref<72x256xf32, #tpu.memory_space<vmem>>, vector<4x256xf32>
    tpu.vector_store %arg8[%c56_96, %c0_97], %101 {strides = array<i32>} : memref<72x256xf32, #tpu.memory_space<vmem>>, vector<4x256xf32>,
    %c0_98 = arith.constant 0 : index
    %c145_99 = arith.constant 145 : index
    %103 = vector.load %arg7[%c0_98, %c145_99] : memref<4x512xf32, #tpu.memory_space<vmem>>, vector<4x256xf32>
    %c8_100 = arith.constant 8 : index
    %c0_101 = arith.constant 0 : index
    %104 = vector.load %arg2[%c8_100, %c0_101] : memref<9x256xf32, #tpu.memory_space<vmem>>, vector<1x256xf32>
    %105 = vector.broadcast %104 : vector<1x256xf32> to vector<4x256xf32>
    %106 = arith.mulf %103, %105 : vector<4x256xf32>
    %c64_102 = arith.constant 64 : index
    %c0_103 = arith.constant 0 : index
    %107 = vector.load %arg8[%c64_102, %c0_103] : memref<72x256xf32, #tpu.memory_space<vmem>>, vector<4x256xf32>
    tpu.vector_store %arg8[%c64_102, %c0_103], %106 {strides = array<i32>} : memref<72x256xf32, #tpu.memory_space<vmem>>, vector<4x256xf32>,
    %c0_104 = arith.constant 0 : index
    %c0_105 = arith.constant 0 : index
    %108 = vector.load %arg3[%c0_104, %c0_105] : memref<8x72xf32, #tpu.memory_space<vmem>>, vector<8x72xf32>
    %c0_106 = arith.constant 0 : index
    %c0_107 = arith.constant 0 : index
    %109 = vector.load %arg8[%c0_106, %c0_107] : memref<72x256xf32, #tpu.memory_space<vmem>>, vector<72x256xf32>
    %cst_108 = arith.constant dense<0.000000e+00> : vector<8x256xf32>
    %110 = tpu.matmul %108, %109, %cst_108 {dimension_numbers = #tpu.dot_dimension_numbers<[1], [0], [0], [1], [0, 0, 1, 1], [], []>} : vector<8x72xf32>, vector<72x256xf32>, vector<8x256xf32> -> vector<8x256xf32>
    %c1_109 = arith.constant 1 : index
    %c0_110 = arith.constant 0 : index
    %c0_111 = arith.constant 0 : index
    %111 = vector.load %arg4[%c1_109, %c0_110, %c0_111] : memref<2x8x256xf32, #tpu.memory_space<vmem>>, vector<1x8x256xf32>
    %112 = vector.shape_cast %111 : vector<1x8x256xf32> to vector<8x256xf32>
    %113 = vector.shape_cast %110 : vector<8x256xf32> to vector<1x8x256xf32>
    tpu.vector_store %arg4[%c1_109, %c0_110, %c0_111], %113 {strides = array<i32>} : memref<2x8x256xf32, #tpu.memory_space<vmem>>, vector<1x8x256xf32>,
    %c0_112 = arith.constant 0 : index
    %c0_113 = arith.constant 0 : index
    %114 = vector.load %arg5[%c0_112, %c0_113] : memref<8x1xf32, #tpu.memory_space<vmem>>, vector<8x1xf32>
    %cst_114 = arith.constant dense<0.000000e+00> : vector<8xf32>
    %115 = vector.multi_reduction <add>, %110, %cst_114 [1] : vector<8x256xf32> to vector<8xf32>
    %116 = vector.shape_cast %115 : vector<8xf32> to vector<8x1xf32>
    %117 = arith.addf %114, %116 : vector<8x1xf32>
    %c0_115 = arith.constant 0 : index
    %c0_116 = arith.constant 0 : index
    %118 = vector.load %arg5[%c0_115, %c0_116] : memref<8x1xf32, #tpu.memory_space<vmem>>, vector<8x1xf32>
    tpu.vector_store %arg5[%c0_115, %c0_116], %117 {strides = array<i32>} : memref<8x1xf32, #tpu.memory_space<vmem>>, vector<8x1xf32>,
    %c0_117 = arith.constant 0 : index
    %c0_118 = arith.constant 0 : index
    %119 = vector.load %arg6[%c0_117, %c0_118] : memref<8x1xf32, #tpu.memory_space<vmem>>, vector<8x1xf32>
    %120 = arith.mulf %110, %110 : vector<8x256xf32>
    %cst_119 = arith.constant dense<0.000000e+00> : vector<8xf32>
    %121 = vector.multi_reduction <add>, %120, %cst_119 [1] : vector<8x256xf32> to vector<8xf32>
    %122 = vector.shape_cast %121 : vector<8xf32> to vector<8x1xf32>
    %123 = arith.addf %119, %122 : vector<8x1xf32>
    %c0_120 = arith.constant 0 : index
    %c0_121 = arith.constant 0 : index
    %124 = vector.load %arg6[%c0_120, %c0_121] : memref<8x1xf32, #tpu.memory_space<vmem>>, vector<8x1xf32>
    tpu.vector_store %arg6[%c0_120, %c0_121], %123 {strides = array<i32>} : memref<8x1xf32, #tpu.memory_space<vmem>>, vector<8x1xf32>,
    return
  }
  func.func @transform_0(%arg0: i32) -> (i32, i32, i32) {
    %c0_i32 = arith.constant 0 : i32
    %c0_i32_0 = arith.constant 0 : i32
    %c0_i32_1 = arith.constant 0 : i32
    return %arg0, %c0_i32, %c0_i32_0 : i32, i32, i32
  }
  func.func @transform_1(%arg0: i32) -> (i32, i32) {
    %c0_i32 = arith.constant 0 : i32
    %c0_i32_0 = arith.constant 0 : i32
    %c0_i32_1 = arith.constant 0 : i32
    return %c0_i32, %c0_i32_0 : i32, i32
  }
  func.func @transform_2(%arg0: i32) -> (i32, i32) {
    %c0_i32 = arith.constant 0 : i32
    %c0_i32_0 = arith.constant 0 : i32
    %c0_i32_1 = arith.constant 0 : i32
    return %c0_i32, %c0_i32_0 : i32, i32
  }
  func.func @transform_3(%arg0: i32) -> (i32, i32, i32) {
    %c0_i32 = arith.constant 0 : i32
    %c0_i32_0 = arith.constant 0 : i32
    %c0_i32_1 = arith.constant 0 : i32
    return %arg0, %c0_i32, %c0_i32_0 : i32, i32, i32
  }
  func.func @transform_4(%arg0: i32) -> (i32, i32) {
    %c0_i32 = arith.constant 0 : i32
    %c0_i32_0 = arith.constant 0 : i32
    %c0_i32_1 = arith.constant 0 : i32
    return %c0_i32, %c0_i32_0 : i32, i32
  }
  func.func @transform_5(%arg0: i32) -> (i32, i32) {
    %c0_i32 = arith.constant 0 : i32
    %c0_i32_0 = arith.constant 0 : i32
    %c0_i32_1 = arith.constant 0 : i32
    return %c0_i32, %c0_i32_0 : i32, i32
  }
}

module attributes {stable_mosaic.version = 11 : i64} {
  func.func @_bn_relu_kernel(%arg0: i32, %arg1: memref<2x8x256xf32, #tpu.memory_space<vmem>>, %arg2: memref<8x1xf32, #tpu.memory_space<vmem>>, %arg3: memref<8x1xf32, #tpu.memory_space<vmem>>, %arg4: memref<8x1xf32, #tpu.memory_space<vmem>>, %arg5: memref<8x1xf32, #tpu.memory_space<vmem>>, %arg6: memref<2x8x256xf32, #tpu.memory_space<vmem>>) attributes {dimension_semantics = [#tpu.dimension_semantics<parallel>], iteration_bounds = array<i64: 1>, scalar_prefetch = 0 : i64, scratch_operands = 0 : i64, tpu.core_type = #tpu.core_type<tc>, window_params = [{transform_indices = @transform_0, window_bounds = array<i64: 2, 8, 256>}, {pipeline_mode = #tpu.pipeline_mode<synchronous>, transform_indices = @transform_1, window_bounds = array<i64: 8, 1>}, {pipeline_mode = #tpu.pipeline_mode<synchronous>, transform_indices = @transform_2, window_bounds = array<i64: 8, 1>}, {pipeline_mode = #tpu.pipeline_mode<synchronous>, transform_indices = @transform_3, window_bounds = array<i64: 8, 1>}, {pipeline_mode = #tpu.pipeline_mode<synchronous>, transform_indices = @transform_4, window_bounds = array<i64: 8, 1>}, {transform_indices = @transform_5, window_bounds = array<i64: 2, 8, 256>}]} {
    %c0 = arith.constant 0 : index
    %c0_0 = arith.constant 0 : index
    %0 = vector.load %arg2[%c0, %c0_0] : memref<8x1xf32, #tpu.memory_space<vmem>>, vector<8x1xf32>
    %cst = arith.constant 0.001953125 : f32
    %1 = vector.broadcast %cst : f32 to vector<8x1xf32>
    %2 = arith.mulf %0, %1 : vector<8x1xf32>
    %c0_1 = arith.constant 0 : index
    %c0_2 = arith.constant 0 : index
    %3 = vector.load %arg3[%c0_1, %c0_2] : memref<8x1xf32, #tpu.memory_space<vmem>>, vector<8x1xf32>
    %cst_3 = arith.constant 0.001953125 : f32
    %4 = vector.broadcast %cst_3 : f32 to vector<8x1xf32>
    %5 = arith.mulf %3, %4 : vector<8x1xf32>
    %6 = arith.mulf %2, %2 : vector<8x1xf32>
    %7 = arith.subf %5, %6 : vector<8x1xf32>
    %cst_4 = arith.constant 0.000000e+00 : f32
    %8 = vector.broadcast %cst_4 : f32 to vector<8x1xf32>
    %9 = arith.maximumf %7, %8 : vector<8x1xf32>
    %c0_5 = arith.constant 0 : index
    %c0_6 = arith.constant 0 : index
    %10 = vector.load %arg4[%c0_5, %c0_6] : memref<8x1xf32, #tpu.memory_space<vmem>>, vector<8x1xf32>
    %cst_7 = arith.constant 9.99999974E-6 : f32
    %11 = vector.broadcast %cst_7 : f32 to vector<8x1xf32>
    %12 = arith.addf %9, %11 : vector<8x1xf32>
    %13 = math.rsqrt %12 : vector<8x1xf32>
    %14 = arith.mulf %10, %13 : vector<8x1xf32>
    %c0_8 = arith.constant 0 : index
    %c0_9 = arith.constant 0 : index
    %15 = vector.load %arg5[%c0_8, %c0_9] : memref<8x1xf32, #tpu.memory_space<vmem>>, vector<8x1xf32>
    %16 = arith.mulf %2, %14 : vector<8x1xf32>
    %17 = arith.subf %15, %16 : vector<8x1xf32>
    %c0_10 = arith.constant 0 : index
    %c0_11 = arith.constant 0 : index
    %c0_12 = arith.constant 0 : index
    %18 = vector.load %arg1[%c0_10, %c0_11, %c0_12] : memref<2x8x256xf32, #tpu.memory_space<vmem>>, vector<2x8x256xf32>
    %19 = vector.shape_cast %14 : vector<8x1xf32> to vector<1x8x1xf32>
    %20 = vector.broadcast %19 : vector<1x8x1xf32> to vector<2x8x256xf32>
    %21 = arith.mulf %18, %20 : vector<2x8x256xf32>
    %22 = vector.shape_cast %17 : vector<8x1xf32> to vector<1x8x1xf32>
    %23 = vector.broadcast %22 : vector<1x8x1xf32> to vector<2x8x256xf32>
    %24 = arith.addf %21, %23 : vector<2x8x256xf32>
    %cst_13 = arith.constant 0.000000e+00 : f32
    %25 = vector.broadcast %cst_13 : f32 to vector<2x8x256xf32>
    %26 = arith.maximumf %24, %25 : vector<2x8x256xf32>
    %c0_14 = arith.constant 0 : index
    %c0_15 = arith.constant 0 : index
    %c0_16 = arith.constant 0 : index
    %27 = vector.load %arg6[%c0_14, %c0_15, %c0_16] : memref<2x8x256xf32, #tpu.memory_space<vmem>>, vector<2x8x256xf32>
    tpu.vector_store %arg6[%c0_14, %c0_15, %c0_16], %26 {strides = array<i32>} : memref<2x8x256xf32, #tpu.memory_space<vmem>>, vector<2x8x256xf32>,
    return
  }
  func.func @transform_0(%arg0: i32) -> (i32, i32, i32) {
    %c0_i32 = arith.constant 0 : i32
    %c0_i32_0 = arith.constant 0 : i32
    %c0_i32_1 = arith.constant 0 : i32
    return %arg0, %c0_i32, %c0_i32_0 : i32, i32, i32
  }
  func.func @transform_1(%arg0: i32) -> (i32, i32) {
    %c0_i32 = arith.constant 0 : i32
    %c0_i32_0 = arith.constant 0 : i32
    %c0_i32_1 = arith.constant 0 : i32
    return %c0_i32, %c0_i32_0 : i32, i32
  }
  func.func @transform_2(%arg0: i32) -> (i32, i32) {
    %c0_i32 = arith.constant 0 : i32
    %c0_i32_0 = arith.constant 0 : i32
    %c0_i32_1 = arith.constant 0 : i32
    return %c0_i32, %c0_i32_0 : i32, i32
  }
  func.func @transform_3(%arg0: i32) -> (i32, i32) {
    %c0_i32 = arith.constant 0 : i32
    %c0_i32_0 = arith.constant 0 : i32
    %c0_i32_1 = arith.constant 0 : i32
    return %c0_i32, %c0_i32_0 : i32, i32
  }
  func.func @transform_4(%arg0: i32) -> (i32, i32) {
    %c0_i32 = arith.constant 0 : i32
    %c0_i32_0 = arith.constant 0 : i32
    %c0_i32_1 = arith.constant 0 : i32
    return %c0_i32, %c0_i32_0 : i32, i32
  }
  func.func @transform_5(%arg0: i32) -> (i32, i32, i32) {
    %c0_i32 = arith.constant 0 : i32
    %c0_i32_0 = arith.constant 0 : i32
    %c0_i32_1 = arith.constant 0 : i32
    return %arg0, %c0_i32, %c0_i32_0 : i32, i32, i32
  }
}

</mosaic_0001>

<bundles_post_ra>
// kernel: depthwise_separable_conv.3
= control target key start
LH: loop header
LB: loop body
LE: loop exit
PB: predicated region body
PF: predicated region fallthrough
CT: control target
= control target key end

     0   :  { %v72_v0 = vmov 0   ;;  %s139_s1 = inlined_call_operand.vmem [shape: f32[8,1], index: 1, kind: input, shape index: {}]   ;;  %s140_s2 = inlined_call_operand.vmem [shape: f32[8,1], index: 2, kind: input, shape index: {}]   ;;  %s141_s3 = inlined_call_operand.vmem [shape: f32[8,1], index: 3, kind: input, shape index: {}]   ;;  %s142_s4 = inlined_call_operand.vmem [shape: f32[8,1], index: 4, kind: input, shape index: {}]   ;;  %s143_s0 = inlined_call_operand.vmem [shape: f32[2,8,256], index: 0, kind: input, shape index: {}]   ;;  %s144_s5 = inlined_call_operand.vmem [shape: f32[2,8,256], index: 5, kind: output, shape index: {}]  }
   0x1   :  { %69 = vset.pattern.permute.xlu0 %v72_v0  ;;  %v20_v1 = vld [vmem:[%s139_s1] sm:$0xff]  ;;  %v35_v17 = vld [vmem:[%s143_s0 + $0x8] sm:$0xff]  ;;  %v36_v18 = vld [vmem:[%s143_s0 + $0x10] sm:$0xff] }
   0x2   :  { %v22_v2 = vld [vmem:[%s140_s2] sm:$0xff]  ;;  %v21_v3 = vmul.f32 0.001953125, %v20_v1  ;;  %v37_v19 = vld [vmem:[%s143_s0 + $0x18] sm:$0xff] }
   0x3   :  { %v23_v4 = vmul.f32 0.001953125, %v22_v2  ;;  %v27_v9 = vld [vmem:[%s141_s3] sm:$0xff] }
   0x4   :  { %v24_v5 = vmul.f32 %v21_v3, %v21_v3  ;;  %v31_v12 = vld [vmem:[%s142_s4] sm:$0xff] }
   0x5   :  { %v34_v15 = vld [vmem:[%s143_s0] sm:$0xff] }
   0x6   :  { %v25_v6 = vsub.f32 %v23_v4, %v24_v5 }
   0x8   :  { %v26_v7 = vmax.f32 %v25_v6, 0.0 }
   0xa   :  { %v28_v8 = vadd.f32 1e-05, %v26_v7 }
   0xc   :  { %70 = vrsqrt.f32 %v28_v8 }
  0x16   :  { %v71_v10 = vpop.eup %70 }
  0x17   :  { %v30_v11 = vmul.f32 %v71_v10, %v27_v9 }
  0x19   :  { %40 = vperm.xlu0 %69, %v30_v11   ;;  %v32_v13 = vmul.f32 %v30_v11, %v21_v3 }
  0x1b   :  { %v33_v14 = vsub.f32 %v31_v12, %v32_v13 }
  0x1d   :  { %49 = vperm.xlu0 %69, %v33_v14  }
  0x98   :  { %v41_v16 = vpop.permute.xlu0 %40 }
  0x99   :  { %v43_v20 = vmul.f32 %v41_v16, %v34_v15  ;;  %v44_v21 = vmul.f32 %v41_v16, %v35_v17  ;;  %v45_v22 = vmul.f32 %v41_v16, %v36_v18  ;;  %v46_v23 = vmul.f32 %v41_v16, %v37_v19 }
  0x9c   :  { %v50_v24 = vpop.permute.xlu0 %49 }
  0x9d   :  { %v52_v25 = vadd.f32 %v50_v24, %v43_v20  ;;  %v53_v26 = vadd.f32 %v50_v24, %v44_v21  ;;  %v54_v27 = vadd.f32 %v50_v24, %v45_v22  ;;  %v55_v28 = vadd.f32 %v50_v24, %v46_v23 }
  0x9f   :  { %v56_v29 = vmax.f32 %v52_v25, 0.0  ;;  %v57_v30 = vmax.f32 %v53_v26, 0.0  ;;  %v58_v31 = vmax.f32 %v54_v27, 0.0  ;;  %v59_v32 = vmax.f32 %v55_v28, 0.0 }
  0xa1   :  { %60 = vst [vmem:[%s144_s5] sm:$0xff] %v56_v29  ;;  %61 = vst [vmem:[%s144_s5 + $0x8] sm:$0xff] %v57_v30 }
  0xa2   :  { %62 = vst [vmem:[%s144_s5 + $0x10] sm:$0xff] %v58_v31  ;;  %63 = vst [vmem:[%s144_s5 + $0x18] sm:$0xff] %v59_v32 }

// kernel: depthwise_separable_conv.2
= control target key start
LH: loop header
LB: loop body
LE: loop exit
PB: predicated region body
PF: predicated region fallthrough
CT: control target
= control target key end

     0   :  { %v50_v0 = vlaneseq  ;;  %v944_v1 = vmov 0.0   ;;  %s945_s7 = smov 113   ;;  %s946_s8 = smov 111   ;;  %vm101_vm0 = vcmask 916480   ;;  %vm179_vm1 = vcmask 1039360   ;;  %s1398_s1 = inlined_call_operand.vmem [shape: f32[9,256], index: 1, kind: input, shape index: {}]   ;;  %s1399_s0 = inlined_call_operand.vmem [shape: f32[2,4,256], index: 0, kind: input, shape index: {}]   ;;  %s1400_s2 = inlined_call_operand.vmem [shape: f32[8,72], index: 2, kind: input, shape index: {}]   ;;  %s1401_s4 = inlined_call_operand.vmem [shape: f32[8,1], index: 4, kind: output, shape index: {1}]   ;;  %s1402_s3 = inlined_call_operand.vmem [shape: f32[2,8,256], index: 3, kind: output, shape index: {0}]   ;;  %s1403_s5 = inlined_call_operand.vmem [shape: f32[8,1], index: 5, kind: output, shape index: {2}]  }
   0x1   :  { %21 = vst [vmem:[#allocation2] sm:$0xff] %v944_v1  ;;  %22 = vst [vmem:[#allocation2 + $0x8] sm:$0xff] %v944_v1  ;;  %441 = vmatprep.mubr.f32.mxu0 %v944_v1  ;;  %846 = vmatprep.mubr.f32.mxu1 %v944_v1  ;;  %v883_v3 = vld [vmem:[%s1398_s1 + $0x2] ss:$8 sm:$0x3]  ;;  %s947_s17 = smov 127  }
   0x2   :  { %23 = vst [vmem:[#allocation3] sm:$0xff] %v944_v1  ;;  %24 = vst [vmem:[#allocation3 + $0x8] sm:$0xff] %v944_v1  ;;  %v51_v2 = vshrl.u32 %v50_v0, 7  ;;  %v48_v4 = vld [vmem:[%s1398_s1] ss:$8 sm:$0x3] }
   0x3   :  { %25 = vst [vmem:[#allocation3 + $0x10] sm:$0xff] %v944_v1  ;;  %26 = vst [vmem:[#allocation3 + $0x18] sm:$0xff] %v944_v1  ;;  %v884_v5 = vld [vmem:[%s1398_s1 + $0x3] ss:$8 sm:$0x3]  ;;  %s948_s18 = smov 112  }
   0x4   :  { %27 = vst [vmem:[#allocation3 + $0x20] sm:$0xff] %v944_v1  ;;  %28 = vst [vmem:[#allocation3 + $0x28] sm:$0xff] %v944_v1  ;;  %v1014_v6 = vsub.s32 0, %v51_v2  ;;  %v1016_v7 = vsub.s32 1, %v51_v2  ;;  %v1024_v9 = vld [vmem:[%s1399_s0] sm:$0xff]  ;;  %v1060_v31 = vld [vmem:[%s1399_s0 + $0x8] sm:$0xff] }
   0x5   :  { %29 = vst [vmem:[#allocation3 + $0x30] sm:$0xff] %v944_v1  ;;  %30 = vst [vmem:[#allocation3 + $0x38] sm:$0xff] %v944_v1  ;;  %v882_v8 = vld [vmem:[%s1398_s1 + $0x1] ss:$8 sm:$0x3]  ;;  %s949_s20 = smov 1  }
   0x6   :  { %31 = vst [vmem:[#allocation3 + $0x40] sm:$0xff] %v944_v1  ;;  %32 = vst [vmem:[#allocation3 + $0x48] sm:$0xff] %v944_v1  ;;  %v131_v10 = vrot.slane %v883_v3, %v1014_v6  ;;  %v135_v11 = vrot.slane %v883_v3, %v1016_v7  ;;  %v53_v12 = vrot.slane %v48_v4, %v1014_v6  ;;  %v469_v14 = vld [vmem:[%s1398_s1] ss:$8 sm:$0x3]  ;;  %s950_s25 = smov 15  }
   0x7   :  { %33 = vst [vmem:[#allocation3 + $0x50] sm:$0xff] %v944_v1  ;;  %34 = vst [vmem:[#allocation3 + $0x58] sm:$0xff] %v944_v1  ;;  %v57_v13 = vrot.slane %v48_v4, %v1016_v7  ;;  %v170_v15 = vrot.slane %v884_v5, %v1014_v6  ;;  %v174_v16 = vrot.slane %v884_v5, %v1016_v7  ;;  %v885_v19 = vld [vmem:[%s1398_s1 + $0x5] ss:$8 sm:$0x3]  ;;  %s951_s30 = smov 16  }
   0x8   :  { %35 = vst [vmem:[#allocation3 + $0x60] sm:$0xff] %v944_v1  ;;  %36 = vst [vmem:[#allocation3 + $0x68] sm:$0xff] %v944_v1  ;;  %v92_v17 = vrot.slane %v882_v8, %v1014_v6  ;;  %v96_v18 = vrot.slane %v882_v8, %v1016_v7  ;;  %v136_v20 = vcombine.low %v131_v10, %v135_v11  ;;  %v891_v28 = vld [vmem:[%s1398_s1 + $0x1] ss:$8 sm:$0x3]  ;;  %s952_s12 = smov 17  }
   0x9   :  { %37 = vst [vmem:[#allocation3 + $0x70] sm:$0xff] %v944_v1  ;;  %38 = vst [vmem:[#allocation3 + $0x78] sm:$0xff] %v944_v1  ;;  %v58_v21 = vcombine.low %v53_v12, %v57_v13  ;;  %v175_v22 = vcombine.low %v170_v15, %v174_v16  ;;  %v474_v23 = vrot.slane %v469_v14, %v1014_v6  ;;  %v886_v29 = vld [vmem:[%s1398_s1 + $0x6] ss:$8 sm:$0x3]  ;;  %vm62_vm2 = vcmask 908288  }
   0xa   :  { %39 = vst [vmem:[#allocation3 + $0x80] sm:$0xff] %v944_v1  ;;  %40 = vst [vmem:[#allocation3 + $0x88] sm:$0xff] %v944_v1  ;;  %v478_v24 = vrot.slane %v469_v14, %v1016_v7  ;;  %137 = vrot.lane.b32.xlu1 %v136_v20, %s945_s7  ;;  %v97_v25 = vcombine.low %v92_v17, %v96_v18  ;;  %v214_v26 = vrot.slane %v885_v19, %v1014_v6  ;;  %v887_v30 = vld [vmem:[%s1398_s1 + $0x7] ss:$8 sm:$0x3]  ;;  %vm155_vm3 = vcmask 121856  }
   0xb   :  { %45 = vst [vmem:[#allocation2 + $0x4] sm:$0xff] %v1024_v9  ;;  %204 = vst [vmem:[#allocation3 + $0x40] sm:$0xf] %v1024_v9  ;;  %59 = vrot.lane.b32.xlu0 %v58_v21, %s946_s8  ;;  %v218_v27 = vrot.slane %v885_v19, %v1016_v7  ;;  %v510_v33 = vrot.slane %v891_v28, %v1014_v6  ;;  %v514_v34 = vrot.slane %v891_v28, %v1016_v7  ;;  %v892_v43 = vld [vmem:[%s1398_s1 + $0x2] ss:$8 sm:$0x3] }
   0xc   :  { %v479_v32 = vcombine.low %v474_v23, %v478_v24  ;;  %v251_v39 = vrot.slane %v886_v29, %v1014_v6  ;;  %v255_v40 = vrot.slane %v886_v29, %v1016_v7  ;;  %v288_v45 = vrot.slane %v887_v30, %v1014_v6  ;;  %v893_v50 = vld [vmem:[%s1398_s1 + $0x3] ss:$8 sm:$0x3]  ;;  %v888_v51 = vld [vmem:[%s1398_s1 + $0x10] ss:$8 sm:$0x3] }
   0xd   :  { %v219_v38 = vcombine.low %v214_v26, %v218_v27  ;;  %v515_v44 = vcombine.low %v510_v33, %v514_v34  ;;  %v292_v46 = vrot.slane %v887_v30, %v1016_v7  ;;  %v546_v48 = vrot.slane %v892_v43, %v1014_v6  ;;  %v894_v58 = vld [vmem:[%s1398_s1 + $0x5] ss:$8 sm:$0x3]  ;;  %v895_v59 = vld [vmem:[%s1398_s1 + $0x6] ss:$8 sm:$0x3] }
   0xe   :  { %176 = vrot.lane.b32.xlu1 %v175_v22, %s947_s17  ;;  %v256_v47 = vcombine.low %v251_v39, %v255_v40  ;;  %v550_v49 = vrot.slane %v892_v43, %v1016_v7  ;;  %v582_v52 = vrot.slane %v893_v50, %v1014_v6  ;;  %v586_v53 = vrot.slane %v893_v50, %v1016_v7  ;;  %v896_v3 = vld [vmem:[%s1398_s1 + $0x7] ss:$8 sm:$0x3]  ;;  %v897_v4 = vld [vmem:[%s1398_s1 + $0x10] ss:$8 sm:$0x3] }
   0xf   :  { %98 = vrot.lane.b32.xlu0 %v97_v25, %s948_s18  ;;  %v325_v54 = vrot.slane %v888_v51, %v1014_v6  ;;  %v293_v55 = vcombine.low %v288_v45, %v292_v46  ;;  %v329_v57 = vrot.slane %v888_v51, %v1016_v7  ;;  %v623_v61 = vrot.slane %v894_v58, %v1014_v6  ;;  %v281_v45 = vld [vmem:[#allocation2 + $0xc] sm:$0xf] }
  0x10   :  { %v551_v56 = vcombine.low %v546_v48, %v550_v49  ;;  %v587_v60 = vcombine.low %v582_v52, %v586_v53  ;;  %v627_v62 = vrot.slane %v894_v58, %v1016_v7  ;;  %v659_v0 = vrot.slane %v895_v59, %v1014_v6 }
  0x11   :  { %v330_v63 = vcombine.low %v325_v54, %v329_v57  ;;  %v663_v2 = vrot.slane %v895_v59, %v1016_v7  ;;  %v695_v8 = vrot.slane %v896_v3, %v1014_v6  ;;  %v699_v10 = vrot.slane %v896_v3, %v1016_v7 }
  0x12   :  { %v1064_v35 = vld [vmem:[#allocation2] sm:$0xff]  ;;  %v1066_v36 = vld [vmem:[#allocation2 + $0x8] sm:$0xf]  ;;  %480 = vrot.lane.b32.xlu1 %v479_v32, %s946_s8  ;;  %v628_v5 = vcombine.low %v623_v61, %v627_v62  ;;  %v731_v12 = vrot.slane %v897_v4, %v1014_v6  ;;  %v735_v13 = vrot.slane %v897_v4, %v1016_v7  ;;  %vm140_vm4 = vcmask 924672  }
  0x13   :  { %v1068_v37 = vld [vmem:[#allocation2 + $0x8] sm:$0xf]  ;;  %220 = vrot.lane.b32.xlu0 %v219_v38, %s949_s20  ;;  %v664_v11 = vcombine.low %v659_v0, %v663_v2  ;;  %v700_v14 = vcombine.low %v695_v8, %v699_v10  ;;  %v617_v8 = vld [vmem:[#allocation2 + $0xc] sm:$0xf]  ;;  %vm77_vm5 = vcmask 138240   ;;  %vm41_vm6 = vcmask 7168  }
  0x14   :  { %v1074_v41 = vld [vmem:[#allocation2 + $0x8] sm:$0xf]  ;;  %v736_v15 = vcombine.low %v731_v12, %v735_v13  ;;  %vm116_vm7 = vcmask 130048   ;;  %vm373_vm8 = vcmask 588800   ;;  %42 = vst.msk [vmem:[%s1401_s4] sm:$0xff] %vm41_vm6, %v944_v1  ;;  %43 = vst.msk [vmem:[%s1403_s5] sm:$0xff] %vm41_vm6, %v944_v1 }
  0x15   :  { %v85_v42 = vld [vmem:[#allocation2 + $0x8] sm:$0xf] }
  0x16   :  { %466 = vst [vmem:[#allocation2 + $0x4] sm:$0xff] %v1060_v31  ;;  %257 = vrot.lane.b32.xlu1 %v256_v47, %s950_s25 }
  0x17   :  { %516 = vrot.lane.b32.xlu0 %v515_v44, %s948_s18 }
  0x1a   :  { %552 = vrot.lane.b32.xlu1 %v551_v56, %s945_s7 }
  0x1b   :  { %294 = vrot.lane.b32.xlu0 %v293_v55, %s951_s30 }
  0x1d   :  { %v468_v24 = vld [vmem:[#allocation2 + $0x8] sm:$0xf]  ;;  %v467_v59 = vld [vmem:[#allocation2] sm:$0xff] }
  0x1e   :  { %331 = vrot.lane.b32.xlu1 %v330_v63, %s952_s12  ;;  %v504_v32 = vld [vmem:[#allocation2 + $0x8] sm:$0xf]  ;;  %v318_v63 = vld [vmem:[#allocation2 + $0xc] sm:$0xf] }
  0x1f   :  { %588 = vrot.lane.b32.xlu0 %v587_v60, %s947_s17  ;;  %v540_v50 = vld [vmem:[#allocation2 + $0x8] sm:$0xf] }
  0x20   :  { %v576_v56 = vld [vmem:[#allocation2 + $0x8] sm:$0xf] }
  0x22   :  { %665 = vrot.lane.b32.xlu1 %v664_v11, %s950_s25 }
  0x23   :  { %629 = vrot.lane.b32.xlu0 %v628_v5, %s949_s20 }
  0x26   :  { %737 = vrot.lane.b32.xlu1 %v736_v15, %s952_s12 }
  0x27   :  { %701 = vrot.lane.b32.xlu0 %v700_v14, %s951_s30 }
  0x7c   :  { %v1126_v16 = vpop.permute.xlu1 %137 }
  0x7d   :  { %v1128_v17 = vpop.permute.xlu0 %59  ;;  %v139_v21 = vrot.slane %v1126_v16, 4 }
  0x7e   :  { %v61_v18 = vrot.slane %v1128_v17, 4 }
  0x7f   :  { %v145_v27 = vmul.f32 %v139_v21, %v1066_v36 }
  0x80   :  { %v67_v6 = vmul.f32 %v61_v18, %v1068_v37  ;;  %v177_v7 = vpop.permute.xlu1 %176  ;;  %v244_v37 = vld [vmem:[#allocation2 + $0xc] sm:$0xf] }
  0x81   :  { %v99_v19 = vpop.permute.xlu0 %98  ;;  %v178_v28 = vrot.slane %v177_v7, 4 }
  0x82   :  { %v100_v20 = vrot.slane %v99_v19, 4  ;;  %75 = vrot.lane.b32.xlu1 %v67_v6, %s952_s12 }
  0x83   :  { %v184_v38 = vmul.f32 %v178_v28, %v1074_v41  ;;  %v180_v53 = vsel %vm179_vm1, %v178_v28, %v177_v7  ;;  %v63_v7 = vsel %vm62_vm2, %v61_v18, %v1128_v17  ;;  %v141_v17 = vsel %vm140_vm4, %v139_v21, %v1126_v16 }
  0x84   :  { %v106_v22 = vmul.f32 %v100_v20, %v85_v42  ;;  %v481_v23 = vpop.permute.xlu1 %480  ;;  %v207_v42 = vld [vmem:[#allocation2 + $0xc] sm:$0xf]  ;;  %v102_v47 = vsel %vm101_vm0, %v100_v20, %v99_v19  ;;  %v1173_v57 = vmul.f32 %v180_v53, %v1064_v35 }
  0x85   :  { %v1136_v25 = vpop.permute.xlu0 %220  ;;  %v482_v26 = vrot.slane %v481_v23, 4  ;;  %v1164_v51 = vmul.f32 %v1064_v35, %v102_v47 }
  0x86   :  { %114 = vrot.lane.b32.xlu1 %v106_v22, %s951_s30  ;;  %v222_v39 = vrot.slane %v1136_v25, 4  ;;  %v66_v22 = vmul.f32 %v1064_v35, %v63_v7 }
  0x87   :  { %v487_v29 = vmul.f32 %v482_v26, %v468_v24  ;;  %v483_v60 = vsel %vm62_vm2, %v482_v26, %v481_v23  ;;  %v144_v24 = vmul.f32 %v141_v17, %v1064_v35 }
  0x88   :  { %v258_v33 = vpop.permute.xlu1 %257  ;;  %v227_v46 = vmul.f32 %v222_v39, %v207_v42  ;;  %v486_v0 = vmul.f32 %v483_v60, %v467_v59  ;;  %v223_v26 = vsel %vm41_vm6, %v222_v39, %v1136_v25  ;;  %v653_v60 = vld [vmem:[#allocation2 + $0xc] sm:$0xf] }
  0x89   :  { %v1142_v30 = vpop.permute.xlu0 %516  ;;  %495 = vrot.lane.b32.xlu0 %v487_v29, %s952_s12  ;;  %v259_v40 = vrot.slane %v258_v33, 4  ;;  %v226_v16 = vmul.f32 %v223_v26, %v1024_v9 }
  0x8a   :  { %v518_v34 = vrot.slane %v1142_v30, 4  ;;  %153 = vrot.lane.b32.xlu1 %v145_v27, %s950_s25  ;;  %v490_v28 = vcombine.high %v486_v0, %v486_v0 }
  0x8b   :  { %v264_v44 = vmul.f32 %v259_v40, %v244_v37  ;;  %v260_v3 = vsel %vm155_vm3, %v259_v40, %v258_v33 }
  0x8c   :  { %v523_v36 = vmul.f32 %v518_v34, %v504_v32  ;;  %v553_v48 = vpop.permute.xlu1 %552  ;;  %v263_v10 = vmul.f32 %v260_v3, %v1024_v9  ;;  %v519_v27 = vsel %vm101_vm0, %v518_v34, %v1142_v30 }
  0x8d   :  { %v1151_v43 = vpop.permute.xlu0 %294  ;;  %v554_v52 = vrot.slane %v553_v48, 4  ;;  %v522_v21 = vmul.f32 %v519_v27, %v467_v59 }
  0x8e   :  { %192 = vrot.lane.b32.xlu1 %v184_v38, %s949_s20  ;;  %531 = vrot.lane.b32.xlu0 %v523_v36, %s951_s30  ;;  %v296_v41 = vrot.slane %v1151_v43, 4  ;;  %v267_v30 = vcombine.high %v263_v10, %v263_v10  ;;  %v70_v38 = vcombine.high %v66_v22, %v66_v22  ;;  %v109_v36 = vcombine.high %v1164_v51, %v1164_v51 }
  0x8f   :  { %v559_v55 = vmul.f32 %v554_v52, %v540_v50  ;;  %v555_v13 = vsel %vm140_vm4, %v554_v52, %v553_v48  ;;  %v526_v35 = vcombine.high %v522_v21, %v522_v21 }
  0x90   :  { %v301_v49 = vmul.f32 %v296_v41, %v281_v45  ;;  %v332_v61 = vpop.permute.xlu1 %331  ;;  %v558_v6 = vmul.f32 %v555_v13, %v467_v59  ;;  %v297_v25 = vsel %vm116_vm7, %v296_v41, %v1151_v43  ;;  %v202_v43 = vcombine.high %v1024_v9, %v1024_v9 }
  0x91   :  { %v1167_v54 = vpop.permute.xlu0 %588  ;;  %v333_v2 = vrot.slane %v332_v61, 4  ;;  %v300_v29 = vmul.f32 %v297_v25, %v1024_v9  ;;  %v148_v41 = vcombine.high %v144_v24, %v144_v24 }
  0x92   :  { %235 = vrot.lane.b32.xlu1 %v227_v46, %s947_s17  ;;  %272 = vrot.lane.b32.xlu0 %v264_v44, %s945_s7  ;;  %v590_v58 = vrot.slane %v1167_v54, 4  ;;  %v562_v37 = vcombine.high %v558_v6, %v558_v6  ;;  %205 = vst [vmem:[#allocation3 + $0x48] sm:$0xf] %v202_v43 }
  0x93   :  { %v338_v5 = vmul.f32 %v333_v2, %v318_v63  ;;  %v334_v19 = vsel %vm77_vm5, %v333_v2, %v332_v61  ;;  %v304_v34 = vcombine.high %v300_v29, %v300_v29 }
  0x94   :  { %v595_v62 = vmul.f32 %v590_v58, %v576_v56  ;;  %v1184_v12 = vpop.permute.xlu1 %665  ;;  %v337_v23 = vmul.f32 %v334_v19, %v1024_v9  ;;  %v591_v32 = vsel %vm179_vm1, %v590_v58, %v1167_v54  ;;  %v187_v9 = vcombine.high %v1173_v57, %v1173_v57  ;;  %v1259_v54 = vld [vmem:[#allocation3 + $0x40] sm:$0xff] }
  0x95   :  { %v630_v4 = vpop.permute.xlu0 %629  ;;  %v667_v15 = vrot.slane %v1184_v12, 4  ;;  %v594_v33 = vmul.f32 %v591_v32, %v467_v59  ;;  %614 = vst [vmem:[#allocation3 + $0x40] sm:$0xf] %v1060_v31 }
  0x96   :  { %110 = vrot.lane.b32.xlu1 %v1164_v51, %s951_s30  ;;  %309 = vrot.lane.b32.xlu0 %v301_v49, %s948_s18  ;;  %v631_v11 = vrot.slane %v630_v4, 4  ;;  %v341_v46 = vcombine.high %v337_v23, %v337_v23  ;;  %v612_v51 = vcombine.high %v1060_v31, %v1060_v31 }
  0x97   :  { %v668_v20 = vsel %vm155_vm3, %v667_v15, %v1184_v12  ;;  %v598_v39 = vcombine.high %v594_v33, %v594_v33  ;;  %v672_v63 = vmul.f32 %v667_v15, %v653_v60 }
  0x98   :  { %v636_v14 = vmul.f32 %v631_v11, %v617_v8  ;;  %v671_v18 = vmul.f32 %v1060_v31, %v668_v20  ;;  %v632_v42 = vsel %vm41_vm6, %v631_v11, %v630_v4  ;;  %v738_v47 = vpop.permute.xlu1 %737 }
  0x99   :  { %v702_v40 = vpop.permute.xlu0 %701  ;;  %v635_v45 = vmul.f32 %v1060_v31, %v632_v42  ;;  %v739_v49 = vrot.slane %v738_v47, 4  ;;  %v1257_v53 = vld [vmem:[#allocation3 + $0x48] sm:$0xff] }
  0x9a   :  { %188 = vrot.lane.b32.xlu1 %v1173_v57, %s949_s20  ;;  %567 = vrot.lane.b32.xlu0 %v559_v55, %s950_s25  ;;  %v703_v44 = vrot.slane %v702_v40, 4  ;;  %615 = vst [vmem:[#allocation3 + $0x48] sm:$0xf] %v612_v51  ;;  %v675_v56 = vcombine.high %v671_v18, %v671_v18  ;;  %v230_v57 = vcombine.high %v226_v16, %v226_v16 }
  0x9b   :  { %v639_v50 = vcombine.high %v635_v45, %v635_v45  ;;  %v740_v55 = vsel %vm77_vm5, %v739_v49, %v738_v47 }
  0x9c   :  { %v704_v48 = vsel %vm116_vm7, %v703_v44, %v702_v40  ;;  %v743_v58 = vmul.f32 %v1060_v31, %v740_v55 }
  0x9d   :  { %v707_v52 = vmul.f32 %v1060_v31, %v704_v48  ;;  %v725_v31 = vld [vmem:[#allocation2 + $0xc] sm:$0xf] }
  0x9e   :  { %603 = vrot.lane.b32.xlu0 %v595_v62, %s949_s20  ;;  %491 = vrot.lane.b32.xlu1 %v486_v0, %s952_s12  ;;  %v747_v61 = vcombine.high %v743_v58, %v743_v58  ;;  %v689_v62 = vld [vmem:[#allocation2 + $0xc] sm:$0xf]  ;;  %v744_v2 = vmul.f32 %v739_v49, %v725_v31 }
  0x9f   :  { %v711_v59 = vcombine.high %v707_v52, %v707_v52  ;;  %v708_v0 = vmul.f32 %v703_v44, %v689_v62 }
  0xa2   :  { %346 = vrot.lane.b32.xlu0 %v338_v5, %s946_s8  ;;  %268 = vrot.lane.b32.xlu1 %v263_v10, %s945_s7 }
  0xa6   :  { %644 = vrot.lane.b32.xlu0 %v636_v14, %s947_s17  ;;  %563 = vrot.lane.b32.xlu1 %v558_v6, %s950_s25 }
  0xaa   :  { %342 = vrot.lane.b32.xlu1 %v337_v23, %s946_s8  ;;  %71 = vrot.lane.b32.xlu0 %v66_v22, %s952_s12 }
  0xae   :  { %676 = vrot.lane.b32.xlu1 %v671_v18, %s945_s7  ;;  %149 = vrot.lane.b32.xlu0 %v144_v24, %s950_s25 }
  0xb2   :  { %493 = vrot.lane.b32.xlu1 %v490_v28, %s952_s12  ;;  %231 = vrot.lane.b32.xlu0 %v226_v16, %s947_s17 }
  0xb6   :  { %529 = vrot.lane.b32.xlu1 %v526_v35, %s951_s30  ;;  %527 = vrot.lane.b32.xlu0 %v522_v21, %s951_s30 }
  0xba   :  { %270 = vrot.lane.b32.xlu1 %v267_v30, %s945_s7  ;;  %305 = vrot.lane.b32.xlu0 %v300_v29, %s948_s18 }
  0xbe   :  { %307 = vrot.lane.b32.xlu1 %v304_v34, %s948_s18  ;;  %599 = vrot.lane.b32.xlu0 %v594_v33, %s949_s20 }
  0xc2   :  { %565 = vrot.lane.b32.xlu1 %v562_v37, %s950_s25  ;;  %73 = vrot.lane.b32.xlu0 %v70_v38, %s952_s12 }
  0xc6   :  { %601 = vrot.lane.b32.xlu1 %v598_v39, %s949_s20  ;;  %112 = vrot.lane.b32.xlu0 %v109_v36, %s951_s30 }
  0xca   :  { %344 = vrot.lane.b32.xlu1 %v341_v46, %s946_s8  ;;  %151 = vrot.lane.b32.xlu0 %v148_v41, %s950_s25 }
  0xce   :  { %642 = vrot.lane.b32.xlu1 %v639_v50, %s947_s17  ;;  %190 = vrot.lane.b32.xlu0 %v187_v9, %s949_s20 }
  0xd2   :  { %678 = vrot.lane.b32.xlu1 %v675_v56, %s945_s7  ;;  %233 = vrot.lane.b32.xlu0 %v230_v57, %s947_s17 }
  0xd6   :  { %640 = vrot.lane.b32.xlu0 %v635_v45, %s947_s17  ;;  %714 = vrot.lane.b32.xlu1 %v711_v59, %s948_s18 }
  0xda   :  { %680 = vrot.lane.b32.xlu0 %v672_v63, %s945_s7  ;;  %750 = vrot.lane.b32.xlu1 %v747_v61, %s946_s8 }
  0xde   :  { %716 = vrot.lane.b32.xlu0 %v708_v0, %s948_s18  ;;  %748 = vrot.lane.b32.xlu1 %v743_v58, %s946_s8 }
  0xe2   :  { %712 = vrot.lane.b32.xlu0 %v707_v52, %s948_s18 }
  0xe6   :  { %752 = vrot.lane.b32.xlu0 %v744_v2, %s946_s8 }
  0xf4   :  { %v76_v3 = vpop.permute.xlu1 %75 }
  0xf8   :  { %v115_v4 = vpop.permute.xlu1 %114 }
  0xfb   :  { %v496_v8 = vpop.permute.xlu0 %495 }
  0xfc   :  { %v154_v5 = vpop.permute.xlu1 %153 }
 0x100   :  { %v1276_v10 = vpop.permute.xlu1 %192  ;;  %v1278_v11 = vpop.permute.xlu0 %531 }
 0x104   :  { %v1280_v12 = vpop.permute.xlu1 %235  ;;  %v273_v13 = vpop.permute.xlu0 %272 }
 0x108   :  { %v111_v14 = vpop.permute.xlu1 %110  ;;  %v310_v15 = vpop.permute.xlu0 %309 }
 0x10c   :  { %v189_v6 = vpop.permute.xlu1 %188  ;;  %v1282_v7 = vpop.permute.xlu0 %567 }
 0x110   :  { %v1284_v19 = vpop.permute.xlu0 %603  ;;  %v492_v20 = vpop.permute.xlu1 %491 }
 0x114   :  { %v347_v22 = vpop.permute.xlu0 %346  ;;  %v269_v23 = vpop.permute.xlu1 %268 }
 0x118   :  { %v1286_v17 = vpop.permute.xlu0 %644  ;;  %v1288_v18 = vpop.permute.xlu1 %563 }
 0x11c   :  { %v343_v24 = vpop.permute.xlu1 %342  ;;  %v72_v26 = vpop.permute.xlu0 %71 }
 0x120   :  { %v1290_v27 = vpop.permute.xlu1 %676  ;;  %v150_v16 = vpop.permute.xlu0 %149 }
 0x124   :  { %v494_v21 = vpop.permute.xlu1 %493  ;;  %v1292_v28 = vpop.permute.xlu0 %231 }
 0x125   :  { %v497_v47 = vsel %vm77_vm5, %v492_v20, %v494_v21  ;;  %v498_v48 = vsel %vm77_vm5, %v494_v21, %v496_v8 }
 0x128   :  { %v530_v35 = vpop.permute.xlu1 %529  ;;  %v528_v25 = vpop.permute.xlu0 %527 }
 0x129   :  { %v534_v60 = vsel %vm116_vm7, %v530_v35, %v1278_v11  ;;  %v533_v61 = vsel %vm116_vm7, %v528_v25, %v530_v35 }
 0x12c   :  { %v271_v29 = vpop.permute.xlu1 %270  ;;  %v306_v30 = vpop.permute.xlu0 %305 }
 0x12d   :  { %v274_v32 = vsel %vm140_vm4, %v269_v23, %v271_v29  ;;  %v275_v33 = vsel %vm140_vm4, %v271_v29, %v273_v13 }
 0x12e   :  { %278 = vst [vmem:[#allocation3 + $0x60] sm:$0xf] %v274_v32  ;;  %279 = vst [vmem:[#allocation3 + $0x68] sm:$0xf] %v275_v33 }
 0x130   :  { %v308_v34 = vpop.permute.xlu1 %307  ;;  %v1296_v37 = vpop.permute.xlu0 %599 }
 0x131   :  { %v311_v38 = vsel %vm101_vm0, %v306_v30, %v308_v34  ;;  %v312_v39 = vsel %vm101_vm0, %v308_v34, %v310_v15 }
 0x132   :  { %315 = vst [vmem:[#allocation3 + $0x70] sm:$0xf] %v311_v38  ;;  %316 = vst [vmem:[#allocation3 + $0x78] sm:$0xf] %v312_v39 }
 0x134   :  { %v566_v36 = vpop.permute.xlu1 %565  ;;  %v74_v40 = vpop.permute.xlu0 %73 }
 0x135   :  { %v78_v42 = vsel %vm77_vm5, %v72_v26, %v74_v40  ;;  %v79_v43 = vsel %vm77_vm5, %v74_v40, %v76_v3  ;;  %v570_v11 = vsel %vm155_vm3, %v566_v36, %v1282_v7  ;;  %v368_v30 = vld [vmem:[#allocation3 + $0x68] sm:$0xff] }
 0x136   :  { %82 = vst [vmem:[#allocation3] sm:$0xf] %v78_v42  ;;  %83 = vst [vmem:[#allocation3 + $0x8] sm:$0xf] %v79_v43 }
 0x138   :  { %v602_v44 = vpop.permute.xlu1 %601  ;;  %v113_v45 = vpop.permute.xlu0 %112 }
 0x139   :  { %v117_v46 = vsel %vm116_vm7, %v111_v14, %v113_v45  ;;  %v118_v41 = vsel %vm116_vm7, %v113_v45, %v115_v4  ;;  %v569_v4 = vsel %vm155_vm3, %v1288_v18, %v566_v36  ;;  %v605_v18 = vsel %vm41_vm6, %v1296_v37, %v602_v44  ;;  %v370_v36 = vld [vmem:[#allocation3 + $0x78] sm:$0xff] }
 0x13a   :  { %121 = vst [vmem:[#allocation3 + $0x10] sm:$0xf] %v117_v46  ;;  %122 = vst [vmem:[#allocation3 + $0x18] sm:$0xf] %v118_v41  ;;  %v369_v46 = vld [vmem:[#allocation3 + $0x70] sm:$0xff] }
 0x13c   :  { %v345_v49 = vpop.permute.xlu1 %344  ;;  %v152_v50 = vpop.permute.xlu0 %151 }
 0x13d   :  { %v348_v9 = vsel %vm62_vm2, %v343_v24, %v345_v49  ;;  %v349_v51 = vsel %vm62_vm2, %v345_v49, %v347_v22  ;;  %v156_v52 = vsel %vm155_vm3, %v150_v16, %v152_v50  ;;  %v157_v55 = vsel %vm155_vm3, %v152_v50, %v154_v5  ;;  %v356_v56 = vld [vmem:[#allocation3 + $0x8] sm:$0xff]  ;;  %v355_v57 = vld [vmem:[#allocation3] sm:$0xff] }
 0x13e   :  { %352 = vst [vmem:[#allocation3 + $0x80] sm:$0xf] %v348_v9  ;;  %353 = vst [vmem:[#allocation3 + $0x88] sm:$0xf] %v349_v51  ;;  %v606_v24 = vsel %vm41_vm6, %v602_v44, %v1284_v19 }
 0x13f   :  { %160 = vst [vmem:[#allocation3 + $0x20] sm:$0xf] %v156_v52  ;;  %161 = vst [vmem:[#allocation3 + $0x28] sm:$0xf] %v157_v55  ;;  %v770_v52 = vld [vmem:[#allocation3 + $0x48] sm:$0xff]  ;;  %v769_v55 = vld [vmem:[#allocation3 + $0x40] sm:$0xff] }
 0x140   :  { %502 = vst [vmem:[#allocation3 + $0x8] sm:$0xf] %v498_v48  ;;  %501 = vst [vmem:[#allocation3] sm:$0xf] %v497_v47  ;;  %v643_v58 = vpop.permute.xlu1 %642  ;;  %v191_v59 = vpop.permute.xlu0 %190 }
 0x141   :  { %v195_v62 = vsel %vm41_vm6, %v189_v6, %v191_v59  ;;  %v196_v63 = vsel %vm41_vm6, %v191_v59, %v1276_v10  ;;  %v358_v0 = vld [vmem:[#allocation3 + $0x18] sm:$0xff]  ;;  %v357_v31 = vld [vmem:[#allocation3 + $0x10] sm:$0xff]  ;;  %v1320_v10 = vld [vmem:[#allocation3 + $0x60] sm:$0xff]  ;;  %v647_v34 = vsel %vm179_vm1, %v643_v58, %v1286_v17  ;;  %v913_v17 = vpack.c.bf16 %v370_v36, %v368_v30 }
 0x142   :  { %199 = vst [vmem:[#allocation3 + $0x30] sm:$0xf] %v195_v62  ;;  %200 = vst [vmem:[#allocation3 + $0x38] sm:$0xf] %v196_v63  ;;  %v901_v2 = vpack.c.bf16 %v358_v0, %v356_v56  ;;  %v903_v3 = vpack.c.bf16 %v357_v31, %v355_v57  ;;  %v354_v63 = vld [vmem:[%s1400_s2] sm:$0xff] }
 0x143   :  { %538 = vst [vmem:[#allocation3 + $0x18] sm:$0xf] %v534_v60  ;;  %537 = vst [vmem:[#allocation3 + $0x10] sm:$0xf] %v533_v61 }
 0x144   :  { %v679_v5 = vpop.permute.xlu1 %678  ;;  %902 = vmatprep.subr.bf16.mxu0 %v901_v2  ;;  %v234_v8 = vpop.permute.xlu0 %233 }
 0x145   :  { %v682_v15 = vsel %vm140_vm4, %v1290_v27, %v679_v5  ;;  %v237_v6 = vsel %vm179_vm1, %v1292_v28, %v234_v8  ;;  %v238_v20 = vsel %vm179_vm1, %v234_v8, %v1280_v12  ;;  %904 = vmatpush1.bf16.msra.mxu0 %v903_v3  ;;  %v371_v41 = vld [vmem:[#allocation3 + $0x80] sm:$0xff] }
 0x146   :  { %v359_v13 = vld [vmem:[#allocation3 + $0x20] sm:$0xff]  ;;  %v360_v14 = vld [vmem:[#allocation3 + $0x28] sm:$0xff]  ;;  %686 = vst [vmem:[#allocation3 + $0x60] sm:$0xf] %v682_v15  ;;  %241 = vst [vmem:[#allocation3 + $0x50] sm:$0xf] %v237_v6 }
 0x147   :  { %573 = vst [vmem:[#allocation3 + $0x20] sm:$0xf] %v569_v4  ;;  %574 = vst [vmem:[#allocation3 + $0x28] sm:$0xf] %v570_v11  ;;  %v762_v23 = vld [vmem:[#allocation3 + $0x8] sm:$0xff]  ;;  %v761_v35 = vld [vmem:[#allocation3] sm:$0xff] }
 0x148   :  { %242 = vst [vmem:[#allocation3 + $0x58] sm:$0xf] %v238_v20  ;;  %v641_v7 = vpop.permute.xlu0 %640  ;;  %v715_v22 = vpop.permute.xlu1 %714 }
 0x149   :  { %v361_v26 = vld [vmem:[#allocation3 + $0x30] sm:$0xff]  ;;  %v362_v27 = vld [vmem:[#allocation3 + $0x38] sm:$0xff]  ;;  %v646_v38 = vsel %vm179_vm1, %v641_v7, %v643_v58  ;;  %v372_v58 = vld [vmem:[#allocation3 + $0x88] sm:$0xff] }
 0x14a   :  { %v764_v16 = vld [vmem:[#allocation3 + $0x18] sm:$0xff]  ;;  %609 = vst [vmem:[#allocation3 + $0x30] sm:$0xf] %v605_v18  ;;  %610 = vst [vmem:[#allocation3 + $0x38] sm:$0xf] %v606_v24  ;;  %v905_v12 = vpack.c.bf16 %v362_v27, %v360_v14  ;;  %v907_v28 = vpack.c.bf16 %v361_v26, %v359_v13  ;;  %v763_v25 = vld [vmem:[#allocation3 + $0x10] sm:$0xff] }
 0x14b   :  { %v917_v21 = vpack.c.bf16 %v764_v16, %v762_v23  ;;  %v919_v29 = vpack.c.bf16 %v763_v25, %v761_v35 }
 0x14c   :  { %906 = vmatprep.subr.bf16.mxu0 %v905_v12  ;;  %v681_v32 = vpop.permute.xlu0 %680  ;;  %v751_v33 = vpop.permute.xlu1 %750  ;;  %v450_v12 = vld [vmem:[%s1401_s4] sm:$0xff] }
 0x14d   :  { %918 = vmatprep.subr.bf16.mxu1 %v917_v21  ;;  %v365_v37 = vld [vmem:[#allocation3 + $0x50] sm:$0xff]  ;;  %v683_v39 = vsel %vm140_vm4, %v679_v5, %v681_v32  ;;  %908 = vmatpush1.bf16.msra.mxu0 %v907_v28  ;;  %v773_v5 = vld [vmem:[#allocation3 + $0x60] sm:$0xff] }
 0x14e   :  { %920 = vmatpush1.bf16.msra.mxu1 %v919_v29  ;;  %650 = vst [vmem:[#allocation3 + $0x50] sm:$0xf] %v646_v38  ;;  %687 = vst [vmem:[#allocation3 + $0x68] sm:$0xf] %v683_v39  ;;  %v911_v42 = vpack.c.bf16 %v365_v37, %v1259_v54  ;;  %v766_v45 = vld [vmem:[#allocation3 + $0x28] sm:$0xff]  ;;  %v765_v50 = vld [vmem:[#allocation3 + $0x20] sm:$0xff]  ;;  %v915_v54 = vpack.c.bf16 %v369_v46, %v1320_v10 }
 0x14f   :  { %v366_v19 = vld [vmem:[#allocation3 + $0x58] sm:$0xff]  ;;  %v456_v28 = vld [vmem:[%s1403_s5] sm:$0xff] }
 0x150   :  { %651 = vst [vmem:[#allocation3 + $0x58] sm:$0xf] %v647_v34  ;;  %v909_v40 = vpack.c.bf16 %v366_v19, %v1257_v53  ;;  %v717_v43 = vpop.permute.xlu0 %716  ;;  %v749_v44 = vpop.permute.xlu1 %748 }
 0x151   :  { %v719_v47 = vsel %vm101_vm0, %v715_v22, %v717_v43  ;;  %v754_v48 = vsel %vm62_vm2, %v749_v44, %v751_v33  ;;  %v768_v49 = vld [vmem:[#allocation3 + $0x38] sm:$0xff]  ;;  %v767_v9 = vld [vmem:[#allocation3 + $0x30] sm:$0xff] }
 0x152   :  { %910 = vmatprep.subr.bf16.mxu0 %v909_v40  ;;  %723 = vst [vmem:[#allocation3 + $0x78] sm:$0xf] %v719_v47  ;;  %v921_v53 = vpack.c.bf16 %v768_v49, %v766_v45  ;;  %v923_v51 = vpack.c.bf16 %v767_v9, %v765_v50  ;;  %758 = vst [vmem:[#allocation3 + $0x80] sm:$0xf] %v754_v48 }
 0x153   :  { %912 = vmatpush1.bf16.msra.mxu0 %v911_v42 }
 0x154   :  { %914 = vmatprep.subr.bf16.mxu0 %v913_v17  ;;  %922 = vmatprep.subr.bf16.mxu1 %v921_v53  ;;  %v713_v56 = vpop.permute.xlu0 %712 }
 0x155   :  { %v718_v57 = vsel %vm101_vm0, %v713_v56, %v715_v22  ;;  %924 = vmatpush1.bf16.msra.mxu1 %v923_v51  ;;  %v771_v60 = vld [vmem:[#allocation3 + $0x50] sm:$0xff]  ;;  %v774_v2 = vld [vmem:[#allocation3 + $0x68] sm:$0xff] }
 0x156   :  { %722 = vst [vmem:[#allocation3 + $0x70] sm:$0xf] %v718_v57  ;;  %v927_v62 = vpack.c.bf16 %v771_v60, %v769_v55 }
 0x157   :  { %916 = vmatpush1.bf16.msra.mxu0 %v915_v54  ;;  %v772_v59 = vld [vmem:[#allocation3 + $0x58] sm:$0xff] }
 0x158   :  { %393 = vmatprep.subr.mxu0 %v372_v58  ;;  %v925_v61 = vpack.c.bf16 %v772_v59, %v770_v52  ;;  %v753_v0 = vpop.permute.xlu0 %752 }
 0x159   :  { %v755_v31 = vsel %vm62_vm2, %v751_v33, %v753_v0  ;;  %v776_v3 = vld [vmem:[#allocation3 + $0x78] sm:$0xff]  ;;  %v777_v14 = vld [vmem:[#allocation3 + $0x80] sm:$0xff] }
 0x15a   :  { %926 = vmatprep.subr.bf16.mxu1 %v925_v61  ;;  %759 = vst [vmem:[#allocation3 + $0x88] sm:$0xf] %v755_v31  ;;  %v929_v4 = vpack.c.bf16 %v776_v3, %v774_v2 }
 0x15b   :  { %394 = vmatpush1.msra.mxu0 %v371_v41  ;;  %928 = vmatpush1.bf16.msra.mxu1 %v927_v62 }
 0x15c   :  { %889 = vmatmul.mubr.msk.f32.vlgmr.msra.gmra.mrb[0].mxu0 %vm373_vm8, %v354_v63  ;;  %930 = vmatprep.subr.bf16.mxu1 %v929_v4 }
 0x15d   :  { %v775_v8 = vld [vmem:[#allocation3 + $0x70] sm:$0xff] }
 0x15e   :  { %v931_v11 = vpack.c.bf16 %v775_v8, %v773_v5 }
 0x160   :  { %932 = vmatpush1.bf16.msra.mxu1 %v931_v11 }
 0x161   :  { %v778_v13 = vld [vmem:[#allocation3 + $0x88] sm:$0xff] }
 0x162   :  { %798 = vmatprep.subr.mxu1 %v778_v13 }
 0x164   :  { %799 = vmatpush1.msra.mxu1 %v777_v14 }
 0x165   :  { %898 = vmatmul.mubr.msk.f32.vlgmr.msra.gmra.mrb[0].mxu1 %vm373_vm8, %v354_v63 }
 0x22f   :  { %v443_v10 = vpop.f32.mrb[0].mxu0 }
 0x230   :  { %448 = vst [vmem:[%s1402_s3] sm:$0xff] %v443_v10  ;;  %v445_v15 = vpop.f32.mrb[1].mxu0  ;;  %v457_v6 = vmul.f32 %v443_v10, %v443_v10 }
 0x231   :  { %449 = vst [vmem:[%s1402_s3 + $0x8] sm:$0xff] %v445_v15  ;;  %v458_v20 = vmul.f32 %v445_v15, %v445_v15  ;;  %v451_v7 = vadd.f32 %v445_v15, %v443_v10 }
 0x233   :  { %452 = vadd.xlane.f32.xlu0 %v451_v7  ;;  %v459_v22 = vadd.f32 %v458_v20, %v457_v6 }
 0x235   :  { %460 = vadd.xlane.f32.xlu1 %v459_v22 }
 0x238   :  { %v848_v23 = vpop.f32.mrb[0].mxu1 }
 0x239   :  { %899 = vst [vmem:[%s1402_s3 + $0x10] sm:$0xff] %v848_v23  ;;  %v850_v18 = vpop.f32.mrb[1].mxu1  ;;  %v863_v24 = vmul.f32 %v848_v23, %v848_v23 }
 0x23a   :  { %900 = vst [vmem:[%s1402_s3 + $0x18] sm:$0xff] %v850_v18  ;;  %v864_v26 = vmul.f32 %v850_v18, %v850_v18  ;;  %v857_v27 = vadd.f32 %v850_v18, %v848_v23 }
 0x23c   :  { %858 = vadd.xlane.f32.xlu0 %v857_v27  ;;  %v865_v16 = vadd.f32 %v864_v26, %v863_v24 }
 0x240   :  { %866 = vadd.xlane.f32.xlu0 %v865_v16 }
 0x2c0   :  { %v453_v21 = vpop.xlane.xlu0 %452 }
 0x2c1   :  { %v454_v35 = vadd.f32 %v453_v21, %v450_v12 }
 0x2c2   :  { %v461_v25 = vpop.xlane.xlu1 %460 }
 0x2c3   :  { %455 = vst.msk [vmem:[%s1401_s4] sm:$0xff] %vm41_vm6, %v454_v35  ;;  %v462_v29 = vadd.f32 %v461_v25, %v456_v28 }
 0x2c5   :  { %463 = vst.msk [vmem:[%s1403_s5] sm:$0xff] %vm41_vm6, %v462_v29 }
 0x2c9   :  { %v859_v30 = vpop.xlane.xlu0 %858 }
 0x2ca   :  { %v856_v1 = vld [vmem:[%s1401_s4] sm:$0xff] }
 0x2cb   :  { %v860_v32 = vadd.f32 %v859_v30, %v856_v1 }
 0x2cc   :  { %v862_v33 = vld [vmem:[%s1403_s5] sm:$0xff] }
 0x2cd   :  { %861 = vst.msk [vmem:[%s1401_s4] sm:$0xff] %vm41_vm6, %v860_v32  ;;  %v867_v34 = vpop.xlane.xlu0 %866 }
 0x2ce   :  { %v868_v19 = vadd.f32 %v867_v34, %v862_v33 }
 0x2d0   :  { %869 = vst.msk [vmem:[%s1403_s5] sm:$0xff] %vm41_vm6, %v868_v19 }

</bundles_post_ra>
